<compile_context>
chip_gen: v7x
topology: tpu7x:2x2x1
jax: 0.10.0
libtpu: 0.0.40
codegen_flags: <defaults>
</compile_context>

<pallas_src>
import jax
import jax.numpy as jnp
from jax.experimental import pallas as pl
from jax.experimental.pallas import tpu as pltpu


# ---------------------------------------------------------------------------
# Fused kernel: 6x (Linear(C, 2C) + chunk + reparameterization sample).
# One grid step per plane.  Block = (1, B, C, M): channels on sublanes,
# spatial tokens on lanes (lane-dense, NCHW-native -> zero wrapper transposes).
# ---------------------------------------------------------------------------
def _make_kernel(training):
    def kernel(*refs):
        if training:
            (wmu_ref, wlv_ref, bmu_ref, blv_ref,
             x_ref, eps_ref, sample_ref, mu_ref, logvar_ref) = refs
        else:
            (wmu_ref, wlv_ref, bmu_ref, blv_ref,
             x_ref, sample_ref, mu_ref, logvar_ref) = refs

        p = pl.program_id(0)
        _, bsz, c, m = x_ref.shape                 # block = (1, B, C, M)

        x = x_ref[0]                               # (B, C, M)
        xs = [x[:, k, :] for k in range(c)]        # per-input-channel (B, M)
        eps = eps_ref[0] if training else None     # (B, C, M)

        wbase = p * (c * c)                        # this plane's slice of the
        bbase = p * c                              # flat SMEM weight tables

        # one-hot over the output-channel (sublane) axis; used to assemble the
        # per-channel rows into dense (B, C, M) values -> single lane-dense,
        # full-block stores, no cross-sublane shuffles or masked row stores.
        ch = jax.lax.broadcasted_iota(jnp.int32, (1, c, 1), 1)

        mu_acc = jnp.zeros((bsz, c, m), jnp.float32)
        lv_acc = jnp.zeros((bsz, c, m), jnp.float32)
        s_acc = jnp.zeros((bsz, c, m), jnp.float32) if training else None

        # Linear(C, 2C) as 2*C*C scalar-broadcast VPU MACs (no MXU: K=C=4).
        for j in range(c):
            mu_j = xs[0] * wmu_ref[wbase + j * c]
            lv_j = xs[0] * wlv_ref[wbase + j * c]
            for k in range(1, c):
                mu_j = mu_j + xs[k] * wmu_ref[wbase + j * c + k]
                lv_j = lv_j + xs[k] * wlv_ref[wbase + j * c + k]
            mu_j = mu_j + bmu_ref[bbase + j]
            lv_j = lv_j + blv_ref[bbase + j]

            mask = (ch == j).astype(jnp.float32)              # (1, C, 1)
            mu_acc = mu_acc + mask * mu_j[:, None, :]
            lv_acc = lv_acc + mask * lv_j[:, None, :]
            if training:
                eps_j = eps[:, j, :]                          # (B, M)
                s_j = mu_j + eps_j * jnp.exp(0.5 * lv_j)
                s_acc = s_acc + mask * s_j[:, None, :]

        mu_ref[0] = mu_acc
        logvar_ref[0] = lv_acc
        sample_ref[0] = s_acc if training else mu_acc         # eval: exactly mu

    return kernel


# ---------------------------------------------------------------------------
# Parameters (PyTorch-style Linear(C, 2C) per plane) and SMEM packing.
# ---------------------------------------------------------------------------
def init_hexplane_vae_params(key, latent_channels):
    """6 x Linear(C, 2C), PyTorch layout: (W (2C, C), b (2C,)), uniform init."""
    c = latent_channels
    params = []
    for i in range(6):
        kw, kb = jax.random.split(jax.random.fold_in(key, i))
        bound = 1.0 / (c ** 0.5)
        w = jax.random.uniform(kw, (2 * c, c), jnp.float32, -bound, bound)
        b = jax.random.uniform(kb, (2 * c,), jnp.float32, -bound, bound)
        params.append((w, b))
    return params


def _pack_params(params):
    """Split each Linear into W_mu/W_logvar/b_mu/b_logvar flat scalar tables."""
    c = params[0][0].shape[1]
    wmu = jnp.concatenate([w[:c].reshape(-1) for (w, _) in params])   # (6*C*C,)
    wlv = jnp.concatenate([w[c:].reshape(-1) for (w, _) in params])
    bmu = jnp.concatenate([b[:c] for (_, b) in params])               # (6*C,)
    blv = jnp.concatenate([b[c:] for (_, b) in params])
    return wmu, wlv, bmu, blv


def _draw_eps(key, planes):
    """Per-plane N(0,1) noise (B, C, M) matching torch.randn_like(std)."""
    eps = []
    for i, pln in enumerate(planes):
        b, c, d1, d2 = pln.shape
        eps.append(jax.random.normal(jax.random.fold_in(key, i),
                                     (b, c, d1 * d2), jnp.float32))
    return eps


# ---------------------------------------------------------------------------
# HexPlaneVAE forward wrapper (reshape/pad glue only; no transposes).
# ---------------------------------------------------------------------------
def hexplane_vae_forward(params, planes, *, training, key=None):
    """planes: list of 6 arrays (B, C, D1, D2). Returns (samples, mus, logvars)."""
    n = len(planes)
    b, c = planes[0].shape[0], planes[0].shape[1]
    ms = [pln.shape[2] * pln.shape[3] for pln in planes]
    m_pad = max(128, ((max(ms) + 127) // 128) * 128)   # lane-multiple slab

    def to_slab(per_plane_bcm):
        toks = []
        for t, m in zip(per_plane_bcm, ms):
            t = t.astype(jnp.float32)
            if m < m_pad:
                t = jnp.pad(t, ((0, 0), (0, 0), (0, m_pad - m)))
            toks.append(t)
        return jnp.stack(toks, axis=0)                  # (6, B, C, m_pad)

    # NCHW-native tokens-on-lanes slab: (6, B, C, m_pad).
    x = to_slab([pln.reshape(b, c, m) for pln, m in zip(planes, ms)])

    wmu, wlv, bmu, blv = _pack_params(params)

    blk = pl.BlockSpec((1, b, c, m_pad), lambda i: (i, 0, 0, 0))
    smem = pl.BlockSpec(memory_space=pltpu.MemorySpace.SMEM)

    inputs = [wmu, wlv, bmu, blv, x]
    in_specs = [smem, smem, smem, smem, blk]
    if training:
        if key is None:
            raise ValueError("training=True requires a PRNG key")
        eps_slab = to_slab(_draw_eps(key, planes))
        inputs.append(eps_slab)
        in_specs.append(blk)

    out_shape = tuple(jax.ShapeDtypeStruct((n, b, c, m_pad), jnp.float32)
                      for _ in range(3))

    sample, mu, logvar = pl.pallas_call(
        _make_kernel(training),
        out_shape=out_shape,
        grid=(n,),
        in_specs=in_specs,
        out_specs=(blk, blk, blk),
        compiler_params=pltpu.CompilerParams(
            dimension_semantics=("parallel",)),       # planes independent
    )(*inputs)

    # Unstack back to (B, C, D1, D2): slice + reshape only (no transpose).
    samples, mus, logvars = [], [], []
    for i, (pln, m) in enumerate(zip(planes, ms)):
        _, _, d1, d2 = pln.shape

        def back(t, i=i, m=m, d1=d1, d2=d2):
            return t[i, :, :, :m].reshape(b, c, d1, d2)

        samples.append(back(sample))
        mus.append(back(mu))
        logvars.append(back(logvar))
    return samples, mus, logvars


# ---------------------------------------------------------------------------
# Pure-JAX reference for correctness checks.
# ---------------------------------------------------------------------------
def _reference_forward(params, planes, eps_list=None):
    samples, mus, logvars = [], [], []
    for i, plane in enumerate(planes):
        b, c, d1, d2 = plane.shape
        w, bias = params[i]                                  # (2C, C), (2C,)
        tok = plane.reshape(b, c, d1 * d2)                   # (B, C, M)
        out = jnp.einsum('oc,bcm->bom', w, tok) + bias[None, :, None]
        mu, logvar = out[:, :c, :], out[:, c:, :]
        if eps_list is None:
            sample = mu
        else:
            sample = mu + eps_list[i] * jnp.exp(0.5 * logvar)
        samples.append(sample.reshape(b, c, d1, d2))
        mus.append(mu.reshape(b, c, d1, d2))
        logvars.append(logvar.reshape(b, c, d1, d2))
    return samples, mus, logvars


if __name__ == "__main__":
    key = jax.random.PRNGKey(0)

    latent_channels = 4
    batch = 2
    plane_dims = [(16, 16), (16, 8), (8, 16), (16, 16), (8, 8), (16, 8)]

    pkey, xkey, skey = jax.random.split(key, 3)
    params = init_hexplane_vae_params(pkey, latent_channels)

    planes = [jax.random.normal(jax.random.fold_in(xkey, i),
                                (batch, latent_channels, d1, d2), jnp.float32)
              for i, (d1, d2) in enumerate(plane_dims)]

    # ---- eval mode: deterministic, sample == mu exactly ---------------------
    samples, mus, logvars = hexplane_vae_forward(params, planes, training=False)
    jax.block_until_ready(samples)

    ref_s, ref_m, ref_l = _reference_forward(params, planes)
    for i in range(6):
        assert jnp.allclose(mus[i], ref_m[i], atol=1e-4, rtol=1e-4), \
            f"mu mismatch plane {i}"
        assert jnp.allclose(logvars[i], ref_l[i], atol=1e-4, rtol=1e-4), \
            f"logvar mismatch plane {i}"
        assert bool(jnp.all(samples[i] == mus[i])), f"eval sample != mu plane {i}"

    # ---- training mode: reparameterization with explicit eps ----------------
    s_t, m_t, l_t = hexplane_vae_forward(params, planes, training=True, key=skey)
    jax.block_until_ready(s_t)

    # reference uses the exact same eps draw (same key, same fold_in order)
    eps_bcm = _draw_eps(skey, planes)
    ref_st, _, _ = _reference_forward(params, planes, eps_list=eps_bcm)
    for i in range(6):
        assert jnp.allclose(m_t[i], ref_m[i], atol=1e-4, rtol=1e-4), \
            f"train mu mismatch plane {i}"
        assert jnp.allclose(l_t[i], ref_l[i], atol=1e-4, rtol=1e-4), \
            f"train logvar mismatch plane {i}"
        assert jnp.allclose(s_t[i], ref_st[i], atol=1e-4, rtol=1e-4), \
            f"train sample mismatch plane {i}"
        assert bool(jnp.all(jnp.isfinite(s_t[i]))), \
            f"non-finite training samples plane {i}"

    print("KERNEL_OK")
</pallas_src>

<mosaic_0001>
module attributes {stable_mosaic.version = 11 : i64} {
  func.func @kernel(%arg0: i32, %arg1: memref<96xf32, #tpu.memory_space<smem>>, %arg2: memref<96xf32, #tpu.memory_space<smem>>, %arg3: memref<24xf32, #tpu.memory_space<smem>>, %arg4: memref<24xf32, #tpu.memory_space<smem>>, %arg5: memref<1x2x4x256xf32, #tpu.memory_space<vmem>>, %arg6: memref<1x2x4x256xf32, #tpu.memory_space<vmem>>, %arg7: memref<1x2x4x256xf32, #tpu.memory_space<vmem>>, %arg8: memref<1x2x4x256xf32, #tpu.memory_space<vmem>>) attributes {dimension_semantics = [#tpu.dimension_semantics<parallel>], iteration_bounds = array<i64: 6>, scalar_prefetch = 0 : i64, scratch_operands = 0 : i64, tpu.core_type = #tpu.core_type<tc>, window_params = [{transform_indices = @transform_0, window_bounds = array<i64: 96>}, {transform_indices = @transform_1, window_bounds = array<i64: 96>}, {transform_indices = @transform_2, window_bounds = array<i64: 24>}, {transform_indices = @transform_3, window_bounds = array<i64: 24>}, {transform_indices = @transform_4, window_bounds = array<i64: 1, 2, 4, 256>}, {transform_indices = @transform_5, window_bounds = array<i64: 1, 2, 4, 256>}, {transform_indices = @transform_6, window_bounds = array<i64: 1, 2, 4, 256>}, {transform_indices = @transform_7, window_bounds = array<i64: 1, 2, 4, 256>}]} {
    %c0 = arith.constant 0 : index
    %c0_0 = arith.constant 0 : index
    %c0_1 = arith.constant 0 : index
    %c0_2 = arith.constant 0 : index
    %0 = vector.load %arg5[%c0, %c0_0, %c0_1, %c0_2] : memref<1x2x4x256xf32, #tpu.memory_space<vmem>>, vector<1x2x4x256xf32>
    %1 = vector.shape_cast %0 : vector<1x2x4x256xf32> to vector<2x4x256xf32>
    %2 = vector.extract_strided_slice %1 {offsets = [0, 0, 0], sizes = [2, 1, 256], strides = [1, 1, 1]} : vector<2x4x256xf32> to vector<2x1x256xf32>
    %3 = vector.shape_cast %2 : vector<2x1x256xf32> to vector<2x256xf32>
    %4 = vector.extract_strided_slice %1 {offsets = [0, 1, 0], sizes = [2, 1, 256], strides = [1, 1, 1]} : vector<2x4x256xf32> to vector<2x1x256xf32>
    %5 = vector.shape_cast %4 : vector<2x1x256xf32> to vector<2x256xf32>
    %6 = vector.extract_strided_slice %1 {offsets = [0, 2, 0], sizes = [2, 1, 256], strides = [1, 1, 1]} : vector<2x4x256xf32> to vector<2x1x256xf32>
    %7 = vector.shape_cast %6 : vector<2x1x256xf32> to vector<2x256xf32>
    %8 = vector.extract_strided_slice %1 {offsets = [0, 3, 0], sizes = [2, 1, 256], strides = [1, 1, 1]} : vector<2x4x256xf32> to vector<2x1x256xf32>
    %9 = vector.shape_cast %8 : vector<2x1x256xf32> to vector<2x256xf32>
    %c16_i32 = arith.constant 16 : i32
    %10 = arith.muli %arg0, %c16_i32 : i32
    %c4_i32 = arith.constant 4 : i32
    %11 = arith.muli %arg0, %c4_i32 : i32
    %12 = tpu.iota {dimensions = array<i32: 1>} : vector<1x4x1xi32>
    %cst = arith.constant 0.000000e+00 : f32
    %13 = vector.broadcast %cst : f32 to vector<2x4x256xf32>
    %cst_3 = arith.constant 0.000000e+00 : f32
    %14 = vector.broadcast %cst_3 : f32 to vector<2x4x256xf32>
    %c0_i32 = arith.constant 0 : i32
    %15 = arith.addi %10, %c0_i32 : i32
    %16 = arith.index_cast %15 : i32 to index
    %17 = memref.load %arg1[%16] : memref<96xf32, #tpu.memory_space<smem>>
    %18 = vector.broadcast %17 : f32 to vector<2x256xf32>
    %19 = arith.mulf %3, %18 : vector<2x256xf32>
    %c0_i32_4 = arith.constant 0 : i32
    %20 = arith.addi %10, %c0_i32_4 : i32
    %21 = arith.index_cast %20 : i32 to index
    %22 = memref.load %arg2[%21] : memref<96xf32, #tpu.memory_space<smem>>
    %23 = vector.broadcast %22 : f32 to vector<2x256xf32>
    %24 = arith.mulf %3, %23 : vector<2x256xf32>
    %c0_i32_5 = arith.constant 0 : i32
    %25 = arith.addi %10, %c0_i32_5 : i32
    %c1_i32 = arith.constant 1 : i32
    %26 = arith.addi %25, %c1_i32 : i32
    %27 = arith.index_cast %26 : i32 to index
    %28 = memref.load %arg1[%27] : memref<96xf32, #tpu.memory_space<smem>>
    %29 = vector.broadcast %28 : f32 to vector<2x256xf32>
    %30 = arith.mulf %5, %29 : vector<2x256xf32>
    %31 = arith.addf %19, %30 : vector<2x256xf32>
    %c0_i32_6 = arith.constant 0 : i32
    %32 = arith.addi %10, %c0_i32_6 : i32
    %c1_i32_7 = arith.constant 1 : i32
    %33 = arith.addi %32, %c1_i32_7 : i32
    %34 = arith.index_cast %33 : i32 to index
    %35 = memref.load %arg2[%34] : memref<96xf32, #tpu.memory_space<smem>>
    %36 = vector.broadcast %35 : f32 to vector<2x256xf32>
    %37 = arith.mulf %5, %36 : vector<2x256xf32>
    %38 = arith.addf %24, %37 : vector<2x256xf32>
    %c0_i32_8 = arith.constant 0 : i32
    %39 = arith.addi %10, %c0_i32_8 : i32
    %c2_i32 = arith.constant 2 : i32
    %40 = arith.addi %39, %c2_i32 : i32
    %41 = arith.index_cast %40 : i32 to index
    %42 = memref.load %arg1[%41] : memref<96xf32, #tpu.memory_space<smem>>
    %43 = vector.broadcast %42 : f32 to vector<2x256xf32>
    %44 = arith.mulf %7, %43 : vector<2x256xf32>
    %45 = arith.addf %31, %44 : vector<2x256xf32>
    %c0_i32_9 = arith.constant 0 : i32
    %46 = arith.addi %10, %c0_i32_9 : i32
    %c2_i32_10 = arith.constant 2 : i32
    %47 = arith.addi %46, %c2_i32_10 : i32
    %48 = arith.index_cast %47 : i32 to index
    %49 = memref.load %arg2[%48] : memref<96xf32, #tpu.memory_space<smem>>
    %50 = vector.broadcast %49 : f32 to vector<2x256xf32>
    %51 = arith.mulf %7, %50 : vector<2x256xf32>
    %52 = arith.addf %38, %51 : vector<2x256xf32>
    %c0_i32_11 = arith.constant 0 : i32
    %53 = arith.addi %10, %c0_i32_11 : i32
    %c3_i32 = arith.constant 3 : i32
    %54 = arith.addi %53, %c3_i32 : i32
    %55 = arith.index_cast %54 : i32 to index
    %56 = memref.load %arg1[%55] : memref<96xf32, #tpu.memory_space<smem>>
    %57 = vector.broadcast %56 : f32 to vector<2x256xf32>
    %58 = arith.mulf %9, %57 : vector<2x256xf32>
    %59 = arith.addf %45, %58 : vector<2x256xf32>
    %c0_i32_12 = arith.constant 0 : i32
    %60 = arith.addi %10, %c0_i32_12 : i32
    %c3_i32_13 = arith.constant 3 : i32
    %61 = arith.addi %60, %c3_i32_13 : i32
    %62 = arith.index_cast %61 : i32 to index
    %63 = memref.load %arg2[%62] : memref<96xf32, #tpu.memory_space<smem>>
    %64 = vector.broadcast %63 : f32 to vector<2x256xf32>
    %65 = arith.mulf %9, %64 : vector<2x256xf32>
    %66 = arith.addf %52, %65 : vector<2x256xf32>
    %c0_i32_14 = arith.constant 0 : i32
    %67 = arith.addi %11, %c0_i32_14 : i32
    %68 = arith.index_cast %67 : i32 to index
    %69 = memref.load %arg3[%68] : memref<24xf32, #tpu.memory_space<smem>>
    %70 = vector.broadcast %69 : f32 to vector<2x256xf32>
    %71 = arith.addf %59, %70 : vector<2x256xf32>
    %c0_i32_15 = arith.constant 0 : i32
    %72 = arith.addi %11, %c0_i32_15 : i32
    %73 = arith.index_cast %72 : i32 to index
    %74 = memref.load %arg4[%73] : memref<24xf32, #tpu.memory_space<smem>>
    %75 = vector.broadcast %74 : f32 to vector<2x256xf32>
    %76 = arith.addf %66, %75 : vector<2x256xf32>
    %c0_i32_16 = arith.constant 0 : i32
    %77 = vector.broadcast %c0_i32_16 : i32 to vector<1x4x1xi32>
    %78 = arith.cmpi eq, %12, %77 : vector<1x4x1xi32>
    %79 = arith.extui %78 : vector<1x4x1xi1> to vector<1x4x1xi32>
    %80 = arith.sitofp %79 : vector<1x4x1xi32> to vector<1x4x1xf32>
    %81 = vector.shape_cast %71 : vector<2x256xf32> to vector<2x1x256xf32>
    %82 = vector.broadcast %80 : vector<1x4x1xf32> to vector<2x4x256xf32>
    %83 = vector.broadcast %81 : vector<2x1x256xf32> to vector<2x4x256xf32>
    %84 = arith.mulf %82, %83 : vector<2x4x256xf32>
    %85 = arith.addf %13, %84 : vector<2x4x256xf32>
    %86 = vector.shape_cast %76 : vector<2x256xf32> to vector<2x1x256xf32>
    %87 = vector.broadcast %80 : vector<1x4x1xf32> to vector<2x4x256xf32>
    %88 = vector.broadcast %86 : vector<2x1x256xf32> to vector<2x4x256xf32>
    %89 = arith.mulf %87, %88 : vector<2x4x256xf32>
    %90 = arith.addf %14, %89 : vector<2x4x256xf32>
    %c4_i32_17 = arith.constant 4 : i32
    %91 = arith.addi %10, %c4_i32_17 : i32
    %92 = arith.index_cast %91 : i32 to index
    %93 = memref.load %arg1[%92] : memref<96xf32, #tpu.memory_space<smem>>
    %94 = vector.broadcast %93 : f32 to vector<2x256xf32>
    %95 = arith.mulf %3, %94 : vector<2x256xf32>
    %c4_i32_18 = arith.constant 4 : i32
    %96 = arith.addi %10, %c4_i32_18 : i32
    %97 = arith.index_cast %96 : i32 to index
    %98 = memref.load %arg2[%97] : memref<96xf32, #tpu.memory_space<smem>>
    %99 = vector.broadcast %98 : f32 to vector<2x256xf32>
    %100 = arith.mulf %3, %99 : vector<2x256xf32>
    %c4_i32_19 = arith.constant 4 : i32
    %101 = arith.addi %10, %c4_i32_19 : i32
    %c1_i32_20 = arith.constant 1 : i32
    %102 = arith.addi %101, %c1_i32_20 : i32
    %103 = arith.index_cast %102 : i32 to index
    %104 = memref.load %arg1[%103] : memref<96xf32, #tpu.memory_space<smem>>
    %105 = vector.broadcast %104 : f32 to vector<2x256xf32>
    %106 = arith.mulf %5, %105 : vector<2x256xf32>
    %107 = arith.addf %95, %106 : vector<2x256xf32>
    %c4_i32_21 = arith.constant 4 : i32
    %108 = arith.addi %10, %c4_i32_21 : i32
    %c1_i32_22 = arith.constant 1 : i32
    %109 = arith.addi %108, %c1_i32_22 : i32
    %110 = arith.index_cast %109 : i32 to index
    %111 = memref.load %arg2[%110] : memref<96xf32, #tpu.memory_space<smem>>
    %112 = vector.broadcast %111 : f32 to vector<2x256xf32>
    %113 = arith.mulf %5, %112 : vector<2x256xf32>
    %114 = arith.addf %100, %113 : vector<2x256xf32>
    %c4_i32_23 = arith.constant 4 : i32
    %115 = arith.addi %10, %c4_i32_23 : i32
    %c2_i32_24 = arith.constant 2 : i32
    %116 = arith.addi %115, %c2_i32_24 : i32
    %117 = arith.index_cast %116 : i32 to index
    %118 = memref.load %arg1[%117] : memref<96xf32, #tpu.memory_space<smem>>
    %119 = vector.broadcast %118 : f32 to vector<2x256xf32>
    %120 = arith.mulf %7, %119 : vector<2x256xf32>
    %121 = arith.addf %107, %120 : vector<2x256xf32>
    %c4_i32_25 = arith.constant 4 : i32
    %122 = arith.addi %10, %c4_i32_25 : i32
    %c2_i32_26 = arith.constant 2 : i32
    %123 = arith.addi %122, %c2_i32_26 : i32
    %124 = arith.index_cast %123 : i32 to index
    %125 = memref.load %arg2[%124] : memref<96xf32, #tpu.memory_space<smem>>
    %126 = vector.broadcast %125 : f32 to vector<2x256xf32>
    %127 = arith.mulf %7, %126 : vector<2x256xf32>
    %128 = arith.addf %114, %127 : vector<2x256xf32>
    %c4_i32_27 = arith.constant 4 : i32
    %129 = arith.addi %10, %c4_i32_27 : i32
    %c3_i32_28 = arith.constant 3 : i32
    %130 = arith.addi %129, %c3_i32_28 : i32
    %131 = arith.index_cast %130 : i32 to index
    %132 = memref.load %arg1[%131] : memref<96xf32, #tpu.memory_space<smem>>
    %133 = vector.broadcast %132 : f32 to vector<2x256xf32>
    %134 = arith.mulf %9, %133 : vector<2x256xf32>
    %135 = arith.addf %121, %134 : vector<2x256xf32>
    %c4_i32_29 = arith.constant 4 : i32
    %136 = arith.addi %10, %c4_i32_29 : i32
    %c3_i32_30 = arith.constant 3 : i32
    %137 = arith.addi %136, %c3_i32_30 : i32
    %138 = arith.index_cast %137 : i32 to index
    %139 = memref.load %arg2[%138] : memref<96xf32, #tpu.memory_space<smem>>
    %140 = vector.broadcast %139 : f32 to vector<2x256xf32>
    %141 = arith.mulf %9, %140 : vector<2x256xf32>
    %142 = arith.addf %128, %141 : vector<2x256xf32>
    %c1_i32_31 = arith.constant 1 : i32
    %143 = arith.addi %11, %c1_i32_31 : i32
    %144 = arith.index_cast %143 : i32 to index
    %145 = memref.load %arg3[%144] : memref<24xf32, #tpu.memory_space<smem>>
    %146 = vector.broadcast %145 : f32 to vector<2x256xf32>
    %147 = arith.addf %135, %146 : vector<2x256xf32>
    %c1_i32_32 = arith.constant 1 : i32
    %148 = arith.addi %11, %c1_i32_32 : i32
    %149 = arith.index_cast %148 : i32 to index
    %150 = memref.load %arg4[%149] : memref<24xf32, #tpu.memory_space<smem>>
    %151 = vector.broadcast %150 : f32 to vector<2x256xf32>
    %152 = arith.addf %142, %151 : vector<2x256xf32>
    %c1_i32_33 = arith.constant 1 : i32
    %153 = vector.broadcast %c1_i32_33 : i32 to vector<1x4x1xi32>
    %154 = arith.cmpi eq, %12, %153 : vector<1x4x1xi32>
    %155 = arith.extui %154 : vector<1x4x1xi1> to vector<1x4x1xi32>
    %156 = arith.sitofp %155 : vector<1x4x1xi32> to vector<1x4x1xf32>
    %157 = vector.shape_cast %147 : vector<2x256xf32> to vector<2x1x256xf32>
    %158 = vector.broadcast %156 : vector<1x4x1xf32> to vector<2x4x256xf32>
    %159 = vector.broadcast %157 : vector<2x1x256xf32> to vector<2x4x256xf32>
    %160 = arith.mulf %158, %159 : vector<2x4x256xf32>
    %161 = arith.addf %85, %160 : vector<2x4x256xf32>
    %162 = vector.shape_cast %152 : vector<2x256xf32> to vector<2x1x256xf32>
    %163 = vector.broadcast %156 : vector<1x4x1xf32> to vector<2x4x256xf32>
    %164 = vector.broadcast %162 : vector<2x1x256xf32> to vector<2x4x256xf32>
    %165 = arith.mulf %163, %164 : vector<2x4x256xf32>
    %166 = arith.addf %90, %165 : vector<2x4x256xf32>
    %c8_i32 = arith.constant 8 : i32
    %167 = arith.addi %10, %c8_i32 : i32
    %168 = arith.index_cast %167 : i32 to index
    %169 = memref.load %arg1[%168] : memref<96xf32, #tpu.memory_space<smem>>
    %170 = vector.broadcast %169 : f32 to vector<2x256xf32>
    %171 = arith.mulf %3, %170 : vector<2x256xf32>
    %c8_i32_34 = arith.constant 8 : i32
    %172 = arith.addi %10, %c8_i32_34 : i32
    %173 = arith.index_cast %172 : i32 to index
    %174 = memref.load %arg2[%173] : memref<96xf32, #tpu.memory_space<smem>>
    %175 = vector.broadcast %174 : f32 to vector<2x256xf32>
    %176 = arith.mulf %3, %175 : vector<2x256xf32>
    %c8_i32_35 = arith.constant 8 : i32
    %177 = arith.addi %10, %c8_i32_35 : i32
    %c1_i32_36 = arith.constant 1 : i32
    %178 = arith.addi %177, %c1_i32_36 : i32
    %179 = arith.index_cast %178 : i32 to index
    %180 = memref.load %arg1[%179] : memref<96xf32, #tpu.memory_space<smem>>
    %181 = vector.broadcast %180 : f32 to vector<2x256xf32>
    %182 = arith.mulf %5, %181 : vector<2x256xf32>
    %183 = arith.addf %171, %182 : vector<2x256xf32>
    %c8_i32_37 = arith.constant 8 : i32
    %184 = arith.addi %10, %c8_i32_37 : i32
    %c1_i32_38 = arith.constant 1 : i32
    %185 = arith.addi %184, %c1_i32_38 : i32
    %186 = arith.index_cast %185 : i32 to index
    %187 = memref.load %arg2[%186] : memref<96xf32, #tpu.memory_space<smem>>
    %188 = vector.broadcast %187 : f32 to vector<2x256xf32>
    %189 = arith.mulf %5, %188 : vector<2x256xf32>
    %190 = arith.addf %176, %189 : vector<2x256xf32>
    %c8_i32_39 = arith.constant 8 : i32
    %191 = arith.addi %10, %c8_i32_39 : i32
    %c2_i32_40 = arith.constant 2 : i32
    %192 = arith.addi %191, %c2_i32_40 : i32
    %193 = arith.index_cast %192 : i32 to index
    %194 = memref.load %arg1[%193] : memref<96xf32, #tpu.memory_space<smem>>
    %195 = vector.broadcast %194 : f32 to vector<2x256xf32>
    %196 = arith.mulf %7, %195 : vector<2x256xf32>
    %197 = arith.addf %183, %196 : vector<2x256xf32>
    %c8_i32_41 = arith.constant 8 : i32
    %198 = arith.addi %10, %c8_i32_41 : i32
    %c2_i32_42 = arith.constant 2 : i32
    %199 = arith.addi %198, %c2_i32_42 : i32
    %200 = arith.index_cast %199 : i32 to index
    %201 = memref.load %arg2[%200] : memref<96xf32, #tpu.memory_space<smem>>
    %202 = vector.broadcast %201 : f32 to vector<2x256xf32>
    %203 = arith.mulf %7, %202 : vector<2x256xf32>
    %204 = arith.addf %190, %203 : vector<2x256xf32>
    %c8_i32_43 = arith.constant 8 : i32
    %205 = arith.addi %10, %c8_i32_43 : i32
    %c3_i32_44 = arith.constant 3 : i32
    %206 = arith.addi %205, %c3_i32_44 : i32
    %207 = arith.index_cast %206 : i32 to index
    %208 = memref.load %arg1[%207] : memref<96xf32, #tpu.memory_space<smem>>
    %209 = vector.broadcast %208 : f32 to vector<2x256xf32>
    %210 = arith.mulf %9, %209 : vector<2x256xf32>
    %211 = arith.addf %197, %210 : vector<2x256xf32>
    %c8_i32_45 = arith.constant 8 : i32
    %212 = arith.addi %10, %c8_i32_45 : i32
    %c3_i32_46 = arith.constant 3 : i32
    %213 = arith.addi %212, %c3_i32_46 : i32
    %214 = arith.index_cast %213 : i32 to index
    %215 = memref.load %arg2[%214] : memref<96xf32, #tpu.memory_space<smem>>
    %216 = vector.broadcast %215 : f32 to vector<2x256xf32>
    %217 = arith.mulf %9, %216 : vector<2x256xf32>
    %218 = arith.addf %204, %217 : vector<2x256xf32>
    %c2_i32_47 = arith.constant 2 : i32
    %219 = arith.addi %11, %c2_i32_47 : i32
    %220 = arith.index_cast %219 : i32 to index
    %221 = memref.load %arg3[%220] : memref<24xf32, #tpu.memory_space<smem>>
    %222 = vector.broadcast %221 : f32 to vector<2x256xf32>
    %223 = arith.addf %211, %222 : vector<2x256xf32>
    %c2_i32_48 = arith.constant 2 : i32
    %224 = arith.addi %11, %c2_i32_48 : i32
    %225 = arith.index_cast %224 : i32 to index
    %226 = memref.load %arg4[%225] : memref<24xf32, #tpu.memory_space<smem>>
    %227 = vector.broadcast %226 : f32 to vector<2x256xf32>
    %228 = arith.addf %218, %227 : vector<2x256xf32>
    %c2_i32_49 = arith.constant 2 : i32
    %229 = vector.broadcast %c2_i32_49 : i32 to vector<1x4x1xi32>
    %230 = arith.cmpi eq, %12, %229 : vector<1x4x1xi32>
    %231 = arith.extui %230 : vector<1x4x1xi1> to vector<1x4x1xi32>
    %232 = arith.sitofp %231 : vector<1x4x1xi32> to vector<1x4x1xf32>
    %233 = vector.shape_cast %223 : vector<2x256xf32> to vector<2x1x256xf32>
    %234 = vector.broadcast %232 : vector<1x4x1xf32> to vector<2x4x256xf32>
    %235 = vector.broadcast %233 : vector<2x1x256xf32> to vector<2x4x256xf32>
    %236 = arith.mulf %234, %235 : vector<2x4x256xf32>
    %237 = arith.addf %161, %236 : vector<2x4x256xf32>
    %238 = vector.shape_cast %228 : vector<2x256xf32> to vector<2x1x256xf32>
    %239 = vector.broadcast %232 : vector<1x4x1xf32> to vector<2x4x256xf32>
    %240 = vector.broadcast %238 : vector<2x1x256xf32> to vector<2x4x256xf32>
    %241 = arith.mulf %239, %240 : vector<2x4x256xf32>
    %242 = arith.addf %166, %241 : vector<2x4x256xf32>
    %c12_i32 = arith.constant 12 : i32
    %243 = arith.addi %10, %c12_i32 : i32
    %244 = arith.index_cast %243 : i32 to index
    %245 = memref.load %arg1[%244] : memref<96xf32, #tpu.memory_space<smem>>
    %246 = vector.broadcast %245 : f32 to vector<2x256xf32>
    %247 = arith.mulf %3, %246 : vector<2x256xf32>
    %c12_i32_50 = arith.constant 12 : i32
    %248 = arith.addi %10, %c12_i32_50 : i32
    %249 = arith.index_cast %248 : i32 to index
    %250 = memref.load %arg2[%249] : memref<96xf32, #tpu.memory_space<smem>>
    %251 = vector.broadcast %250 : f32 to vector<2x256xf32>
    %252 = arith.mulf %3, %251 : vector<2x256xf32>
    %c12_i32_51 = arith.constant 12 : i32
    %253 = arith.addi %10, %c12_i32_51 : i32
    %c1_i32_52 = arith.constant 1 : i32
    %254 = arith.addi %253, %c1_i32_52 : i32
    %255 = arith.index_cast %254 : i32 to index
    %256 = memref.load %arg1[%255] : memref<96xf32, #tpu.memory_space<smem>>
    %257 = vector.broadcast %256 : f32 to vector<2x256xf32>
    %258 = arith.mulf %5, %257 : vector<2x256xf32>
    %259 = arith.addf %247, %258 : vector<2x256xf32>
    %c12_i32_53 = arith.constant 12 : i32
    %260 = arith.addi %10, %c12_i32_53 : i32
    %c1_i32_54 = arith.constant 1 : i32
    %261 = arith.addi %260, %c1_i32_54 : i32
    %262 = arith.index_cast %261 : i32 to index
    %263 = memref.load %arg2[%262] : memref<96xf32, #tpu.memory_space<smem>>
    %264 = vector.broadcast %263 : f32 to vector<2x256xf32>
    %265 = arith.mulf %5, %264 : vector<2x256xf32>
    %266 = arith.addf %252, %265 : vector<2x256xf32>
    %c12_i32_55 = arith.constant 12 : i32
    %267 = arith.addi %10, %c12_i32_55 : i32
    %c2_i32_56 = arith.constant 2 : i32
    %268 = arith.addi %267, %c2_i32_56 : i32
    %269 = arith.index_cast %268 : i32 to index
    %270 = memref.load %arg1[%269] : memref<96xf32, #tpu.memory_space<smem>>
    %271 = vector.broadcast %270 : f32 to vector<2x256xf32>
    %272 = arith.mulf %7, %271 : vector<2x256xf32>
    %273 = arith.addf %259, %272 : vector<2x256xf32>
    %c12_i32_57 = arith.constant 12 : i32
    %274 = arith.addi %10, %c12_i32_57 : i32
    %c2_i32_58 = arith.constant 2 : i32
    %275 = arith.addi %274, %c2_i32_58 : i32
    %276 = arith.index_cast %275 : i32 to index
    %277 = memref.load %arg2[%276] : memref<96xf32, #tpu.memory_space<smem>>
    %278 = vector.broadcast %277 : f32 to vector<2x256xf32>
    %279 = arith.mulf %7, %278 : vector<2x256xf32>
    %280 = arith.addf %266, %279 : vector<2x256xf32>
    %c12_i32_59 = arith.constant 12 : i32
    %281 = arith.addi %10, %c12_i32_59 : i32
    %c3_i32_60 = arith.constant 3 : i32
    %282 = arith.addi %281, %c3_i32_60 : i32
    %283 = arith.index_cast %282 : i32 to index
    %284 = memref.load %arg1[%283] : memref<96xf32, #tpu.memory_space<smem>>
    %285 = vector.broadcast %284 : f32 to vector<2x256xf32>
    %286 = arith.mulf %9, %285 : vector<2x256xf32>
    %287 = arith.addf %273, %286 : vector<2x256xf32>
    %c12_i32_61 = arith.constant 12 : i32
    %288 = arith.addi %10, %c12_i32_61 : i32
    %c3_i32_62 = arith.constant 3 : i32
    %289 = arith.addi %288, %c3_i32_62 : i32
    %290 = arith.index_cast %289 : i32 to index
    %291 = memref.load %arg2[%290] : memref<96xf32, #tpu.memory_space<smem>>
    %292 = vector.broadcast %291 : f32 to vector<2x256xf32>
    %293 = arith.mulf %9, %292 : vector<2x256xf32>
    %294 = arith.addf %280, %293 : vector<2x256xf32>
    %c3_i32_63 = arith.constant 3 : i32
    %295 = arith.addi %11, %c3_i32_63 : i32
    %296 = arith.index_cast %295 : i32 to index
    %297 = memref.load %arg3[%296] : memref<24xf32, #tpu.memory_space<smem>>
    %298 = vector.broadcast %297 : f32 to vector<2x256xf32>
    %299 = arith.addf %287, %298 : vector<2x256xf32>
    %c3_i32_64 = arith.constant 3 : i32
    %300 = arith.addi %11, %c3_i32_64 : i32
    %301 = arith.index_cast %300 : i32 to index
    %302 = memref.load %arg4[%301] : memref<24xf32, #tpu.memory_space<smem>>
    %303 = vector.broadcast %302 : f32 to vector<2x256xf32>
    %304 = arith.addf %294, %303 : vector<2x256xf32>
    %c3_i32_65 = arith.constant 3 : i32
    %305 = vector.broadcast %c3_i32_65 : i32 to vector<1x4x1xi32>
    %306 = arith.cmpi eq, %12, %305 : vector<1x4x1xi32>
    %307 = arith.extui %306 : vector<1x4x1xi1> to vector<1x4x1xi32>
    %308 = arith.sitofp %307 : vector<1x4x1xi32> to vector<1x4x1xf32>
    %309 = vector.shape_cast %299 : vector<2x256xf32> to vector<2x1x256xf32>
    %310 = vector.broadcast %308 : vector<1x4x1xf32> to vector<2x4x256xf32>
    %311 = vector.broadcast %309 : vector<2x1x256xf32> to vector<2x4x256xf32>
    %312 = arith.mulf %310, %311 : vector<2x4x256xf32>
    %313 = arith.addf %237, %312 : vector<2x4x256xf32>
    %314 = vector.shape_cast %304 : vector<2x256xf32> to vector<2x1x256xf32>
    %315 = vector.broadcast %308 : vector<1x4x1xf32> to vector<2x4x256xf32>
    %316 = vector.broadcast %314 : vector<2x1x256xf32> to vector<2x4x256xf32>
    %317 = arith.mulf %315, %316 : vector<2x4x256xf32>
    %318 = arith.addf %242, %317 : vector<2x4x256xf32>
    %c0_66 = arith.constant 0 : index
    %c0_67 = arith.constant 0 : index
    %c0_68 = arith.constant 0 : index
    %c0_69 = arith.constant 0 : index
    %319 = vector.load %arg7[%c0_66, %c0_67, %c0_68, %c0_69] : memref<1x2x4x256xf32, #tpu.memory_space<vmem>>, vector<1x2x4x256xf32>
    %320 = vector.shape_cast %319 : vector<1x2x4x256xf32> to vector<2x4x256xf32>
    %321 = vector.shape_cast %313 : vector<2x4x256xf32> to vector<1x2x4x256xf32>
    tpu.vector_store %arg7[%c0_66, %c0_67, %c0_68, %c0_69], %321 {strides = array<i32>} : memref<1x2x4x256xf32, #tpu.memory_space<vmem>>, vector<1x2x4x256xf32>,
    %c0_70 = arith.constant 0 : index
    %c0_71 = arith.constant 0 : index
    %c0_72 = arith.constant 0 : index
    %c0_73 = arith.constant 0 : index
    %322 = vector.load %arg8[%c0_70, %c0_71, %c0_72, %c0_73] : memref<1x2x4x256xf32, #tpu.memory_space<vmem>>, vector<1x2x4x256xf32>
    %323 = vector.shape_cast %322 : vector<1x2x4x256xf32> to vector<2x4x256xf32>
    %324 = vector.shape_cast %318 : vector<2x4x256xf32> to vector<1x2x4x256xf32>
    tpu.vector_store %arg8[%c0_70, %c0_71, %c0_72, %c0_73], %324 {strides = array<i32>} : memref<1x2x4x256xf32, #tpu.memory_space<vmem>>, vector<1x2x4x256xf32>,
    %c0_74 = arith.constant 0 : index
    %c0_75 = arith.constant 0 : index
    %c0_76 = arith.constant 0 : index
    %c0_77 = arith.constant 0 : index
    %325 = vector.load %arg6[%c0_74, %c0_75, %c0_76, %c0_77] : memref<1x2x4x256xf32, #tpu.memory_space<vmem>>, vector<1x2x4x256xf32>
    %326 = vector.shape_cast %325 : vector<1x2x4x256xf32> to vector<2x4x256xf32>
    %327 = vector.shape_cast %313 : vector<2x4x256xf32> to vector<1x2x4x256xf32>
    tpu.vector_store %arg6[%c0_74, %c0_75, %c0_76, %c0_77], %327 {strides = array<i32>} : memref<1x2x4x256xf32, #tpu.memory_space<vmem>>, vector<1x2x4x256xf32>,
    return
  }
  func.func @transform_0(%arg0: i32) -> i32 {
    %c0_i32 = arith.constant 0 : i32
    %c0_i32_0 = arith.constant 0 : i32
    return %c0_i32 : i32
  }
  func.func @transform_1(%arg0: i32) -> i32 {
    %c0_i32 = arith.constant 0 : i32
    %c0_i32_0 = arith.constant 0 : i32
    return %c0_i32 : i32
  }
  func.func @transform_2(%arg0: i32) -> i32 {
    %c0_i32 = arith.constant 0 : i32
    %c0_i32_0 = arith.constant 0 : i32
    return %c0_i32 : i32
  }
  func.func @transform_3(%arg0: i32) -> i32 {
    %c0_i32 = arith.constant 0 : i32
    %c0_i32_0 = arith.constant 0 : i32
    return %c0_i32 : i32
  }
  func.func @transform_4(%arg0: i32) -> (i32, i32, i32, i32) {
    %c0_i32 = arith.constant 0 : i32
    %c0_i32_0 = arith.constant 0 : i32
    %c0_i32_1 = arith.constant 0 : i32
    %c0_i32_2 = arith.constant 0 : i32
    return %arg0, %c0_i32, %c0_i32_0, %c0_i32_1 : i32, i32, i32, i32
  }
  func.func @transform_5(%arg0: i32) -> (i32, i32, i32, i32) {
    %c0_i32 = arith.constant 0 : i32
    %c0_i32_0 = arith.constant 0 : i32
    %c0_i32_1 = arith.constant 0 : i32
    %c0_i32_2 = arith.constant 0 : i32
    return %arg0, %c0_i32, %c0_i32_0, %c0_i32_1 : i32, i32, i32, i32
  }
  func.func @transform_6(%arg0: i32) -> (i32, i32, i32, i32) {
    %c0_i32 = arith.constant 0 : i32
    %c0_i32_0 = arith.constant 0 : i32
    %c0_i32_1 = arith.constant 0 : i32
    %c0_i32_2 = arith.constant 0 : i32
    return %arg0, %c0_i32, %c0_i32_0, %c0_i32_1 : i32, i32, i32, i32
  }
  func.func @transform_7(%arg0: i32) -> (i32, i32, i32, i32) {
    %c0_i32 = arith.constant 0 : i32
    %c0_i32_0 = arith.constant 0 : i32
    %c0_i32_1 = arith.constant 0 : i32
    %c0_i32_2 = arith.constant 0 : i32
    return %arg0, %c0_i32, %c0_i32_0, %c0_i32_1 : i32, i32, i32, i32
  }
}

</mosaic_0001>

<bundles_post_ra>
// kernel: tpu_custom_call.1
= control target key start
LH: loop header
LB: loop body
LE: loop exit
PB: predicated region body
PF: predicated region fallthrough
CT: control target
= control target key end

     0   :  { %s2790_s0 = inlined_call_operand.hbm [shape: f32[96], index: 0, kind: input, shape index: {}]   ;;  %s2791_s1 = inlined_call_operand.vmem [shape: f32[96], index: 1, kind: input, shape index: {}]   ;;  %s2792_s2 = inlined_call_operand.vmem [shape: f32[24], index: 2, kind: input, shape index: {}]   ;;  %s2793_s3 = inlined_call_operand.vmem [shape: f32[24], index: 3, kind: input, shape index: {}]   ;;  %s2794_s4 = inlined_call_operand.hbm [shape: f32[6,2,4,256], index: 4, kind: input, shape index: {}]   ;;  %s2795_s5 = inlined_call_operand.hbm [shape: f32[6,2,4,256], index: 5, kind: output, shape index: {0}]   ;;  %s2796_s6 = inlined_call_operand.hbm [shape: f32[6,2,4,256], index: 6, kind: output, shape index: {1}]   ;;  %s2797_s7 = inlined_call_operand.hbm [shape: f32[6,2,4,256], index: 7, kind: output, shape index: {2}]  }
   0x1   :  { %2837 = sst [smem:[#allocation37_spill]] %s2790_s0 }
   0x2   :  { %2838 = sst [smem:[#allocation38_spill]] %s2791_s1 }
   0x3   :  { %2839 = sst [smem:[#allocation39_spill]] %s2792_s2 }
   0x4   :  { %2840 = sst [smem:[#allocation40_spill]] %s2793_s3 }
   0x5   :  { %2841 = sst [smem:[#allocation41_spill]] %s2794_s4 }
   0x6   :  { %2842 = sst [smem:[#allocation42_spill]] %s2797_s7 }
   0x7   :  { %13 = vsyncpa [#allocation5], 0 }
   0x8   :  { %14 = vsyncpa [#allocation6], 0 }
   0x9   :  { %15 = vsyncpa [#allocation9], 0 }
   0xa   :  { %16 = vsyncpa [#allocation3], 0 }
   0xb   :  { %18 = vsyncpa [#allocation3 + $0x1], 0 }
   0xc   :  { %19 = vsyncpa [#allocation4], 0 }
   0xd   :  { %21 = vsyncpa [#allocation4 + $0x1], 0 }
   0xe   :  { %22 = vsyncpa [#allocation14], 0 }
   0xf   :  { %24 = vsyncpa [#allocation14 + $0x1], 0  ;;  %s1895_s24 = smov 0   ;;  %s1897_s25 = smov 0  }
  0x10   :  { %s1899_s26 = smov 0   ;;  %s1901_s27 = smov 0  }
  0x11 LB: > { %2843 = sst [smem:[#allocation22_spill]] %s1828_s24  ;;  %s1916_s28 = sadd.s32 4294967295, %s1840_s27   ;;  %s1840_s27 = sphi %s1901_s27, %s2912_s27   ;;  %s1836_s26 = sphi %s1899_s26, %s2915_s26   ;;  %s1832_s25 = sphi %s1897_s25, %s2914_s25   ;;  %s1828_s24 = sphi %s1895_s24, %s2913_s24  }
  0x12   : > { %2844 = sst [smem:[#allocation23_spill]] %s1832_s25  ;;  %s2801_s29 = sadd.s32 4294967294, %s1840_s27  }
  0x13   : > { %2845 = sst [smem:[#allocation24_spill]] %s1836_s26  ;;  %p134_p0 = scmp.ne.s32.totalorder %s1832_s25, %s1828_s24 }
  0x14   : > { %2846 = sst [smem:[#allocation25_spill]] %s1840_s27  ;;  %p2798_p1 = scmp.eq.s32.totalorder %s1916_s28, 0 }
  0x15   : > { %p164_p3 = scmp.eq.s32.totalorder %s2801_s29, 5  ;;  %p1425_p5 = scmp.ge.s32.totalorder %s1840_s27, 1 }
  0x16   : > { %p1927_p4 = por %p2798_p1, %p134_p0  ;;  %p223_p7 = scmp.lt.s32.totalorder %s1840_s27, 7 }
  0x17   : > { %p1932_p6 = por %p164_p3, %p134_p0  ;;  %s2850_s2 = sld [smem:[#allocation39_spill]] }
  0x18   : > { %s2847_s30 = scalar_select %p1927_p4, 1, 0 }
  0x19   : > { %s2848_s8 = scalar_select %p1932_p6, 1, 0 }
  0x1a   : > { %p1940_p8 = pnand %p1425_p5, %p223_p7  ;;  %s2852_s1 = sld [smem:[#allocation38_spill]] }
  0x1b   : > { %2849 = sst [smem:[#allocation26_spill]] %s2848_s8  ;;  %s2854_s3 = sld [smem:[#allocation40_spill]] }
  0x1c   : > { %p1536_p9 = pneg %p1940_p8 }
  0x1d   : > { %s256_s11 = sshll.u32 %s2850_s2, 4  ;;  %s257_s11 = int_to_ptr.vmem [resolvable:$true] %s256_s11 }
  0x1e   : > { %p1951_p10 = pnand %p1536_p9, %p2798_p1  ;;  %s1614_s20 = scalar_lea.vmem %s257_s11, 16 }
  0x1f   : > { %p1615_p11 = scmp.ne.s32.totalorder %s257_s11, %s1614_s20  ;;  %p1622_p3 = scmp.lt.s32.totalorder %s257_s11, %s257_s11 }
  0x20   : > { %s245_s15 = sshll.u32 %s2852_s1, 4  ;;  %p1616_p12 = pneg %p1951_p10  ;;  %s1955_s15 = int_to_ptr.vmem [resolvable:$true] %s245_s15 }
  0x21   : > { %s267_s19 = sshll.u32 %s2854_s3, 4  ;;  %p1623_p5 = scmp.lt.s32.totalorder %s1614_s20, %s1614_s20  ;;  %s1960_s19 = int_to_ptr.vmem [resolvable:$true] %s267_s19 }
  0x22   : > { %p1617_p13 = pnand %p1616_p12, %p1615_p11 }
  0x23   : > { %p1624_p7 = por %p1623_p5, %p1622_p3 }
  0x24   : > { %p1618_p0 = pneg %p1617_p13 }
  0x26   : > { %p1625_p9 = pnand %p1624_p7, %p1618_p0 }
  0x28   : > { %1628 = shalt.err (!%p1625_p9)
}
  0x29   : > { %s1842_s21 = smov [#allocation8]   ;;  %s2855_s0 = sld [smem:[#allocation37_spill]] }
  0x2a   : > { %1545 = dma.vmem_to_smem (!%p1951_p10), %s257_s11, 16, %s1842_s21, [#allocation9]  }
  0x2f   : > { %s1629_s9 = scalar_lea.hbm %s2855_s0, 16 }
  0x30   : > { %p1630_p1 = scmp.ne.s32.totalorder %s2855_s0, %s1629_s9  ;;  %p1636_p0 = scmp.lt.u32.totalorder %s1629_s9, %s2855_s0 }
  0x32   : > { %p1632_p11 = pnand %p1630_p1, %p1616_p12 }
  0x34   : > { %p1633_p13 = pneg %p1632_p11 }
  0x36   : > { %p1638_p3 = pnand %p1636_p0, %p1633_p13 }
  0x38   : > { %1641 = shalt.err (!%p1638_p3)
}
  0x39   : > { %s1843_s18 = smov [#allocation2]   ;;  %s1642_s21 = scalar_lea.vmem %s1955_s15, 16 }
  0x3a   : > { %1539 = dma.hbm_to_smem (!%p1951_p10), %s2855_s0, 16, %s1843_s18, [#allocation5]  }
  0x3b   : > { %p1643_p1 = scmp.ne.s32.totalorder %s1955_s15, %s1642_s21  ;;  %p1650_p9 = scmp.lt.s32.totalorder %s1955_s15, %s1955_s15 }
  0x3c   : > { %p1651_p11 = scmp.lt.s32.totalorder %s1642_s21, %s1642_s21 }
  0x3d   : > { %p1645_p5 = pnand %p1643_p1, %p1616_p12 }
  0x3e   : > { %p1652_p13 = por %p1651_p11, %p1650_p9 }
  0x3f   : > { %p1646_p7 = pneg %p1645_p5 }
  0x41   : > { %p1653_p0 = pnand %p1652_p13, %p1646_p7 }
  0x43   : > { %1656 = shalt.err (!%p1653_p0)
}
  0x44   : > { %s1844_s22 = smov [#allocation7]   ;;  %s1657_s23 = scalar_lea.vmem %s1960_s19, 16 }
  0x45   : > { %1542 = dma.vmem_to_smem (!%p1951_p10), %s1955_s15, 16, %s1844_s22, [#allocation6]  }
  0x46   : > { %p1658_p3 = scmp.ne.s32.totalorder %s1960_s19, %s1657_s23  ;;  %p1665_p2 = scmp.lt.s32.totalorder %s1960_s19, %s1960_s19 }
  0x47   : > { %p1666_p9 = scmp.lt.s32.totalorder %s1657_s23, %s1657_s23 }
  0x48   : > { %p1660_p1 = pnand %p1658_p3, %p1616_p12 }
  0x49   : > { %p1667_p7 = por %p1666_p9, %p1665_p2 }
  0x4a   : > { %p1661_p5 = pneg %p1660_p1 }
  0x4c   : > { %p1668_p11 = pnand %p1667_p7, %p1661_p5 }
  0x4e   : > { %1671 = shalt.err (!%p1668_p11)
}
  0x4f   : > { %s1845_s9 = smov [#allocation10]   ;;  %s2007_s15 = sadd.s32 1, %s1840_s27  }
  0x50   : > { %1548 = dma.vmem_to_smem (!%p1951_p10), %s1960_s19, 16, %s1845_s9, [#allocation9]  }
  0x51   : > { %2856 = sst [smem:[#allocation27_spill]] %s2007_s15  ;;  %s118_s10 = ssub.s32 %s1840_s27, %s2007_s15 }
  0x52   : > { %p119_p2 = scmp.eq.s32.totalorder %s118_s10, 0  ;;  %s121_s13 = sadd.s32 1, %s1836_s26 }
  0x53   : > { %p128_p12 = scmp.ne.s32.totalorder %s1836_s26, %s1832_s25  ;;  %p129_p13 = scmp.eq.s32.totalorder %s1840_s27, 0 }
  0x54   : > { %s2016_s16 = scalar_select %p119_p2, %s1836_s26, %s121_s13  }
  0x55   : > { %p130_p0 = por %p129_p13, %p128_p12  ;;  %p2858_p3 = scmp.eq.s32.totalorder %s1916_s28, 5 }
  0x56   : > { %2857 = sst [smem:[#allocation28_spill]] %s2016_s16  ;;  %p1567_p5 = scmp.lt.s32.totalorder %s1840_s27, 6 }
  0x57   : > { %p2020_p1 = por %p2858_p3, %p128_p12  ;;  %s278_s17 = sand.u32 1, %s1836_s26  }
  0x58   : > { %s1431_s18 = sshll.u32 %s278_s17, 4  ;;  %s1508_s19 = sshll.u32 %s1840_s27, 8 }
  0x59   : > { %s2859_s14 = scalar_select %p2020_p1, 1, 0 }
  0x5a   : > { %s2860_s4 = sld [smem:[#allocation41_spill]]  ;;  %s282_s22 = scalar_lea.vmem [#allocation11], %s1431_s18 }
  0x5b   : > { %s289_s23 = sshll.u32 %s282_s22, 4  ;;  %p2034_p10 = pnand %p1567_p5, %p130_p0  ;;  %s2032_s23 = int_to_ptr.vmem [resolvable:$true] %s289_s23 }
  0x5c   : > { %s2038_s10 = scalar_lea.sflag [#allocation3], %s278_s17 }
  0x5d   : > { %p1674_p7 = pneg %p2034_p10 }
  0x60   : > { %s2030_s21 = scalar_lea.hbm %s2860_s4, %s1508_s19  ;;  %s1677_s11 = scalar_lea.hbm %s2860_s4, 1536 }
  0x61   : > { %s1672_s13 = scalar_lea.hbm %s2030_s21, 256  ;;  %p1678_p12 = scmp.lt.u32.totalorder %s2030_s21, %s2860_s4 }
  0x62   : > { %p1673_p9 = scmp.ne.s32.totalorder %s2030_s21, %s1672_s13  ;;  %p1679_p13 = scmp.lt.u32.totalorder %s1677_s11, %s1672_s13 }
  0x63   : > { %p1681_p3 = scmp.lt.u32.totalorder %s1672_s13, %s2030_s21 }
  0x64   : > { %p1675_p11 = pnand %p1674_p7, %p1673_p9  ;;  %p1680_p0 = por %p1679_p13, %p1678_p12 }
  0x66   : > { %p1676_p2 = pneg %p1675_p11  ;;  %p1682_p5 = por %p1681_p3, %p1680_p0 }
  0x68   : > { %p1683_p6 = pnand %p1682_p5, %p1676_p2 }
  0x6a   : > { %1686 = shalt.err (!%p1683_p6)
}
  0x6b   : > { %s1687_s17 = scalar_lea.vmem %s2032_s23, 256  ;;  %s1846_s18 = smov [#allocation11]  }
  0x6c   : > { %p1688_p9 = scmp.ne.s32.totalorder %s2032_s23, %s1687_s17  ;;  %s1692_s19 = sshll.u32 %s1846_s18, 4  ;;  %s1693_s19 = int_to_ptr.vmem [resolvable:$false] %s1692_s19 }
  0x6d   : > { %s1694_s20 = scalar_lea.vmem %s1693_s19, 512  ;;  %p1695_p4 = scmp.lt.s32.totalorder %s2032_s23, %s1693_s19 }
  0x6e   : > { %p1690_p11 = pnand %p1688_p9, %p1674_p7  ;;  %p1696_p12 = scmp.lt.s32.totalorder %s1694_s20, %s1687_s17 }
  0x70   : > { %p1691_p1 = pneg %p1690_p11  ;;  %p1697_p13 = por %p1696_p12, %p1695_p4 }
  0x72   : > { %p1698_p0 = pnand %p1697_p13, %p1691_p1 }
  0x74   : > { %1701 = shalt.err (!%p1698_p0)
}
  0x75   : > { %s1847_s13 = smov 128   ;;  %s1848_s11 = smov 8  }
  0x76   : > { %1552 = dma.hbm_to_vmem [thread:$0]  (!%p2034_p10), %s2030_s21, 256, %s2032_s23, %s2038_s10, %s1847_s13, %s1847_s13, %s1848_s11  }
  0x77   : > { %301 = sbr.rel (%p1940_p8) target bundleno = 301 (0x12d), region = 40 }
  0x7e   : > { %p2862_p6 = scmp.eq.s32.totalorder %s1916_s28, 0 }
  0x80   : > { %1803 = dma.done.wait (%p2862_p6), [#allocation5], 16   ;;  %p2863_p7 = pmov %p2862_p6 }
  0x81   : > { %p2864_p4 = pmov %p2862_p6 }
  0x82   : > { %1805 = vsyncadd (%p2863_p7), [#allocation5], 4294967280 }
  0x83   : > { %1807 = dma.done.wait (%p2864_p4), [#allocation6], 16   ;;  %p2865_p1 = pmov %p2864_p4 }
  0x85   : > { %1809 = vsyncadd (%p2865_p1), [#allocation6], 4294967280  ;;  %p2866_p2 = pmov %p2865_p1 }
  0x86   : > { %p2867_p10 = pmov %p2865_p1 }
  0x87   : > { %1811 = dma.done.wait (%p2866_p2), [#allocation9], 32  }
  0x88   : > { %1813 = vsyncadd (%p2867_p10), [#allocation9], 4294967264  ;;  %s2081_s12 = sand.u32 1, %s1832_s25   ;;  %p2869_p8 = scmp.ne.s32.totalorder %s2847_s30, 0 }
  0x89   : > { %s2084_s21 = sshll.u32 %s2081_s12, 4  ;;  %s320_s23 = scalar_lea.sflag [#allocation3], %s2081_s12 }
  0x8a   : > { %2868 = sst [smem:[#allocation29_spill]] %s2084_s21  ;;  %s323_s9 = scalar_lea.vmem [#allocation11], %s2084_s21 }
  0x8b   : > { %1815 = dma.done.wait (%p2869_p8), %s320_s23, 256  }
  0x8c   : > { %1817 = vsyncadd (%p2869_p8), %s320_s23, 4294967040 }
  0x8d   : > { %328 = sfence }
  0x8e   : > { %s2093_s10 = sshll.u32 %s1916_s28, 4  ;;  %v369_v0 = vlaneseq  ;;  %s2096_s22 = sshll.u32 %s1916_s28, 2  ;;  %v2125_v2 = vld [vmem:[%s323_s9] sm:$0xff]  ;;  %v2133_v4 = vld [vmem:[%s323_s9 + $0x8] sm:$0xff]  ;;  %v1849_v5 = vmov 0.0  }
  0x8f   : > { %s2099_s30 = sld [smem:[#allocation2 + %s2093_s10]]  ;;  %s2802_s17 = sadd.s32 1, %s2093_s10 }
  0x90   : > { %s2804_s18 = sadd.s32 2, %s2093_s10  ;;  %v370_v1 = vshrl.u32 %v369_v0, 7  ;;  %s2105_s19 = sld [smem:[#allocation2 + %s2802_s17]] }
  0x91   : > { %s2109_s20 = sld [smem:[#allocation2 + %s2804_s18]]  ;;  %s2803_s13 = sadd.s32 3, %s2093_s10 }
  0x92   : > { %s2113_s11 = sld [smem:[#allocation8 + %s2096_s22]]  ;;  %vm474_vm0 = vcmp.eq.s32.totalorder %v370_v1, 0  ;;  %s2805_s29 = sadd.s32 4, %s2093_s10  ;;  %vm674_vm1 = vcmp.eq.s32.totalorder %v370_v1, 1  ;;  %vm874_vm2 = vcmp.eq.s32.totalorder %v370_v1, 2  ;;  %vm1074_vm3 = vcmp.eq.s32.totalorder %v370_v1, 3 }
  0x93   : > { %s2117_s23 = sld [smem:[#allocation2 + %s2803_s13]]  ;;  %s2806_s17 = sadd.s32 5, %s2093_s10  ;;  %v2135_v6 = vsel %vm474_vm0, 1.0, %v1849_v5  ;;  %v2137_v7 = vsub.s32 0, %v370_v1  ;;  %v2139_v8 = vsub.s32 4, %v370_v1  ;;  %v2147_v9 = vsel %vm674_vm1, 1.0, %v1849_v5 }
  0x94   : > { %s2122_s0 = sld [smem:[#allocation2 + %s2805_s29]]  ;;  %s2808_s18 = sadd.s32 6, %s2093_s10  ;;  %v2157_v12 = vsel %vm874_vm2, 1.0, %v1849_v5  ;;  %v2160_v13 = vsel %vm1074_vm3, 1.0, %v1849_v5 }
  0x95   : > { %v372_v3 = vstv %s2099_s30  ;;  %s2130_s13 = sld [smem:[#allocation2 + %s2806_s17]]  ;;  %s2807_s30 = sadd.s32 7, %s2093_s10 }
  0x96   : > { %s2143_s29 = sld [smem:[#allocation2 + %s2808_s18]]  ;;  %v381_v10 = vstv %s2105_s19  ;;  %s2809_s17 = sadd.s32 1, %s2096_s22  ;;  %v373_v14 = vmul.f32 %v372_v3, %v2125_v2  ;;  %v374_v20 = vmul.f32 %v372_v3, %v2133_v4 }
  0x97   : > { %v410_v11 = vstv %s2109_s20  ;;  %s2153_s9 = sld [smem:[#allocation2 + %s2807_s30]]  ;;  %v382_v15 = vmul.f32 %v381_v10, %v2125_v2  ;;  %s2810_s20 = sadd.s32 8, %s2093_s10  ;;  %v383_v17 = vmul.f32 %v381_v10, %v2133_v4 }
  0x98   : > { %v411_v16 = vmul.f32 %v410_v11, %v2125_v2  ;;  %s2167_s19 = sld [smem:[#allocation8 + %s2809_s17]]  ;;  %v467_v19 = vstv %s2113_s11  ;;  %s2812_s18 = sadd.s32 9, %s2093_s10  ;;  %v412_v21 = vmul.f32 %v410_v11, %v2133_v4 }
  0x99   : > { %v439_v18 = vstv %s2117_s23  ;;  %s2175_s30 = sld [smem:[#allocation2 + %s2810_s20]]  ;;  %v1445_v22 = vrot.slane %v382_v15, 9  ;;  %s2811_s23 = sadd.s32 10, %s2093_s10  ;;  %v1446_v28 = vrot.slane %v383_v17, 9 }
  0x9a   : > { %v1449_v23 = vrot.slane %v411_v16, 10  ;;  %v440_v24 = vmul.f32 %v439_v18, %v2125_v2  ;;  %v571_v25 = vstv %s2122_s0  ;;  %s2184_s11 = sld [smem:[#allocation2 + %s2812_s18]]  ;;  %s2813_s20 = sadd.s32 11, %s2093_s10  ;;  %v1450_v29 = vrot.slane %v412_v21, 10 }
  0x9b   : > { %v572_v26 = vmul.f32 %v571_v25, %v2125_v2  ;;  %v580_v27 = vstv %s2130_s13  ;;  %s2191_s17 = sld [smem:[#allocation2 + %s2811_s23]]  ;;  %v392_v30 = vadd.f32 %v1445_v22, %v373_v14  ;;  %s2814_s13 = sadd.s32 2, %s2096_s22  ;;  %v393_v36 = vadd.f32 %v1446_v28, %v374_v20 }
  0x9c   : > { %v1453_v31 = vrot.slane %v440_v24, 11  ;;  %v581_v32 = vmul.f32 %v580_v27, %v2125_v2  ;;  %v609_v33 = vstv %s2143_s29  ;;  %s2198_s0 = sld [smem:[#allocation2 + %s2813_s20]]  ;;  %s2815_s18 = sadd.s32 12, %s2093_s10  ;;  %v441_v37 = vmul.f32 %v439_v18, %v2133_v4 }
  0x9d   : > { %v610_v34 = vmul.f32 %v609_v33, %v2125_v2  ;;  %v638_v35 = vstv %s2153_s9  ;;  %s2207_s23 = sld [smem:[#allocation8 + %s2814_s13]]  ;;  %v421_v38 = vadd.f32 %v1449_v23, %v392_v30  ;;  %s2816_s13 = sadd.s32 13, %s2093_s10  ;;  %v422_v44 = vadd.f32 %v1450_v29, %v393_v36 }
  0x9e   : > { %v1458_v39 = vrot.slane %v581_v32, 9  ;;  %v639_v40 = vmul.f32 %v638_v35, %v2125_v2  ;;  %v667_v41 = vstv %s2167_s19  ;;  %s2217_s20 = sld [smem:[#allocation2 + %s2815_s18]]  ;;  %s2817_s2 = sadd.s32 14, %s2093_s10  ;;  %v1454_v45 = vrot.slane %v441_v37, 11 }
  0x9f   : > { %v1462_v42 = vrot.slane %v610_v34, 10  ;;  %v771_v43 = vstv %s2175_s30  ;;  %s2223_s1 = sld [smem:[#allocation2 + %s2816_s13]]  ;;  %v450_v46 = vadd.f32 %v1453_v31, %v421_v38  ;;  %s2819_s3 = sadd.s32 15, %s2093_s10  ;;  %v573_v53 = vmul.f32 %v571_v25, %v2133_v4 }
  0xa0   : > { %v591_v47 = vadd.f32 %v1458_v39, %v572_v26  ;;  %v1466_v48 = vrot.slane %v639_v40, 11  ;;  %v772_v49 = vmul.f32 %v771_v43, %v2125_v2  ;;  %s2231_s18 = sld [smem:[#allocation2 + %s2817_s2]]  ;;  %v780_v50 = vstv %s2184_s11  ;;  %s2818_s4 = sadd.s32 3, %s2096_s22 }
  0xa1   : > { %v809_v51 = vstv %s2191_s17  ;;  %s2238_s13 = sld [smem:[#allocation2 + %s2819_s3]]  ;;  %v451_v52 = vadd.f32 %v1454_v45, %v422_v44  ;;  %v468_v54 = vadd.f32 %v467_v19, %v450_v46  ;;  %v781_v56 = vmul.f32 %v780_v50, %v2125_v2  ;;  %s2870_s30 = sadd.s32 1, %s2093_s10 }
  0xa2   : > { %v620_v55 = vadd.f32 %v1462_v42, %v591_v47  ;;  %v810_v57 = vmul.f32 %v809_v51, %v2125_v2  ;;  %s2250_s2 = sld [smem:[#allocation8 + %s2818_s4]]  ;;  %v838_v58 = vstv %s2198_s0  ;;  %v582_v61 = vmul.f32 %v580_v27, %v2133_v4  ;;  %s2871_s17 = sadd.s32 2, %s2093_s10 }
  0xa3   : > { %v867_v59 = vstv %s2207_s23  ;;  %v469_v60 = vadd.f32 %v467_v19, %v451_v52  ;;  %v482_v62 = vrot.slane %v468_v54, %v2137_v7  ;;  %v486_v63 = vrot.slane %v468_v54, %v2139_v8  ;;  %s2327_s29 = sld [smem:[#allocation7 + %s2093_s10]]  ;;  %s2404_s23 = scalar_lea.vmem [#allocation12], %s2084_s21 }
  0xa4   : > { %v649_v0 = vadd.f32 %v1466_v48, %v620_v55  ;;  %v1471_v1 = vrot.slane %v781_v56, 9  ;;  %v1475_v3 = vrot.slane %v810_v57, 10  ;;  %v839_v5 = vmul.f32 %v838_v58, %v2125_v2  ;;  %s2331_s9 = sld [smem:[#allocation7 + %s2870_s30]]  ;;  %s2872_s30 = sadd.s32 3, %s2093_s10 }
  0xa5   : > { %v971_v10 = vstv %s2217_s20  ;;  %v980_v11 = vstv %s2223_s1  ;;  %v502_v14 = vrot.slane %v482_v62, %v2137_v7  ;;  %v506_v15 = vrot.slane %v486_v63, %v2137_v7  ;;  %s2340_s11 = sld [smem:[#allocation7 + %s2871_s17]]  ;;  %s2873_s20 = sadd.s32 4, %s2093_s10 }
  0xa6   : > { %v668_v16 = vadd.f32 %v667_v41, %v649_v0  ;;  %v791_v17 = vadd.f32 %v1471_v1, %v772_v49  ;;  %v1479_v18 = vrot.slane %v839_v5, 11  ;;  %v972_v19 = vmul.f32 %v971_v10, %v2125_v2  ;;  %s2344_s4 = sld [smem:[#allocation7 + %s2872_s30]]  ;;  %s2874_s1 = sadd.s32 5, %s2093_s10 }
  0xa7   : > { %v981_v20 = vmul.f32 %v980_v11, %v2125_v2  ;;  %v1009_v21 = vstv %s2231_s18  ;;  %v515_v22 = vmul.f32 %v2135_v6, %v502_v14  ;;  %v516_v23 = vmul.f32 %v2135_v6, %v506_v15  ;;  %s2365_s19 = sld [smem:[#allocation10 + %s2096_s22]]  ;;  %s2877_s30 = sadd.s32 7, %s2093_s10 }
  0xa8   : > { %v682_v24 = vrot.slane %v668_v16, %v2137_v7  ;;  %v686_v25 = vrot.slane %v668_v16, %v2139_v8  ;;  %v820_v26 = vadd.f32 %v1475_v3, %v791_v17  ;;  %v1010_v28 = vmul.f32 %v1009_v21, %v2125_v2  ;;  %s2369_s0 = sld [smem:[#allocation7 + %s2873_s20]]  ;;  %s2883_s16 = sadd.s32 10, %s2093_s10 }
  0xa9   : > { %v1484_v27 = vrot.slane %v981_v20, 9  ;;  %v1038_v29 = vstv %s2238_s13  ;;  %v1067_v34 = vstv %s2250_s2  ;;  %v490_v39 = vrot.slane %v469_v60, %v2137_v7  ;;  %s2375_s18 = sld [smem:[#allocation7 + %s2874_s1]]  ;;  %s2876_s13 = sadd.s32 6, %s2093_s10 }
  0xaa   : > { %v702_v30 = vrot.slane %v682_v24, %v2137_v7  ;;  %v706_v31 = vrot.slane %v686_v25, %v2137_v7  ;;  %v1039_v32 = vmul.f32 %v1038_v29, %v2125_v2  ;;  %v849_v36 = vadd.f32 %v1479_v18, %v820_v26  ;;  %s2388_s17 = sld [smem:[#allocation7 + %s2876_s13]]  ;;  %s2395_s1 = scalar_lea.vmem [#allocation13], %s2084_s21 }
  0xab   : > { %v991_v37 = vadd.f32 %v1484_v27, %v972_v19  ;;  %v1488_v38 = vrot.slane %v1010_v28, 10  ;;  %v494_v45 = vrot.slane %v469_v60, %v2139_v8  ;;  %v510_v48 = vrot.slane %v490_v39, %v2137_v7  ;;  %s2392_s20 = sld [smem:[#allocation7 + %s2877_s30]]  ;;  %s2879_s13 = sadd.s32 8, %s2093_s10 }
  0xac   : > { %v715_v40 = vmul.f32 %v2147_v9, %v702_v30  ;;  %v716_v42 = vmul.f32 %v2147_v9, %v706_v31  ;;  %v1492_v44 = vrot.slane %v1039_v32, 11  ;;  %v868_v46 = vadd.f32 %v867_v59, %v849_v36  ;;  %s2413_s30 = sld [smem:[#allocation7 + %s2879_s13]]  ;;  %s2881_s13 = sadd.s32 9, %s2093_s10 }
  0xad   : > { %v1020_v47 = vadd.f32 %v1488_v38, %v991_v37  ;;  %v1459_v49 = vrot.slane %v582_v61, 9  ;;  %v514_v55 = vrot.slane %v494_v45, %v2137_v7  ;;  %v611_v56 = vmul.f32 %v609_v33, %v2133_v4  ;;  %s2427_s3 = sld [smem:[#allocation7 + %s2881_s13]]  ;;  %s2884_s13 = sadd.s32 11, %s2093_s10 }
  0xae   : > { %v719_v52 = vadd.f32 %v715_v40, %v515_v22  ;;  %v720_v54 = vadd.f32 %v716_v42, %v516_v23  ;;  %v882_v57 = vrot.slane %v868_v46, %v2137_v7  ;;  %v886_v60 = vrot.slane %v868_v46, %v2139_v8  ;;  %s2439_s26 = sld [smem:[#allocation7 + %s2883_s16]]  ;;  %s2886_s25 = sadd.s32 1, %s2096_s22 }
  0xaf   : > { %v1049_v62 = vadd.f32 %v1492_v44, %v1020_v47  ;;  %v2301_v63 = vmul.f32 %v2135_v6, %v510_v48  ;;  %v2304_v61 = vmul.f32 %v2135_v6, %v514_v55  ;;  %v592_v0 = vadd.f32 %v1459_v49, %v573_v53  ;;  %2875 = sst [smem:[#allocation30_spill]] %s2375_s18  ;;  %s1231_s15 = sshll.u32 %s2395_s1, 4  ;;  %s2498_s15 = int_to_ptr.vmem [resolvable:$true] %s1231_s15 }
  0xb0   : > { %v1463_v1 = vrot.slane %v611_v56, 10  ;;  %v640_v3 = vmul.f32 %v638_v35, %v2133_v4  ;;  %v902_v33 = vrot.slane %v882_v57, %v2137_v7  ;;  %v906_v5 = vrot.slane %v886_v60, %v2137_v7  ;;  %s2443_s2 = sld [smem:[#allocation7 + %s2884_s13]]  ;;  %s2888_s13 = sadd.s32 2, %s2096_s22 }
  0xb1   : > { %v1068_v14 = vadd.f32 %v1067_v34, %v1049_v62  ;;  %v773_v15 = vmul.f32 %v771_v43, %v2133_v4  ;;  %v782_v53 = vmul.f32 %v780_v50, %v2133_v4  ;;  %v811_v18 = vmul.f32 %v809_v51, %v2133_v4  ;;  %2878 = sst [smem:[#allocation31_spill]] %s2392_s20  ;;  %s2890_s27 = sadd.s32 13, %s2093_s10 }
  0xb2   : > { %v621_v16 = vadd.f32 %v1463_v1, %v592_v0  ;;  %v1467_v17 = vrot.slane %v640_v3, 11  ;;  %v915_v35 = vmul.f32 %v2157_v12, %v902_v33  ;;  %v916_v19 = vmul.f32 %v2157_v12, %v906_v5  ;;  %2880 = sst [smem:[#allocation32_spill]] %s2413_s30  ;;  %s2891_s21 = sadd.s32 14, %s2093_s10 }
  0xb3   : > { %v1082_v20 = vrot.slane %v1068_v14, %v2137_v7  ;;  %v1086_v22 = vrot.slane %v1068_v14, %v2139_v8  ;;  %v1472_v50 = vrot.slane %v782_v53, 9  ;;  %v1476_v51 = vrot.slane %v811_v18, 10  ;;  %2882 = sst [smem:[#allocation33_spill]] %s2427_s3  ;;  %p2896_p5 = scmp.ne.s32.totalorder %s2859_s14, 0 }
  0xb4   : > { %v650_v43 = vadd.f32 %v1467_v17, %v621_v16  ;;  %v840_v23 = vmul.f32 %v838_v58, %v2133_v4  ;;  %v919_v24 = vadd.f32 %v915_v35, %v719_v52  ;;  %v920_v25 = vadd.f32 %v916_v19, %v720_v54  ;;  %s2452_s16 = sld [smem:[#allocation10 + %s2886_s25]]  ;;  %s2889_s25 = sadd.s32 12, %s2093_s10 }
  0xb5   : > { %v1102_v26 = vrot.slane %v1082_v20, %v2137_v7  ;;  %v1106_v27 = vrot.slane %v1086_v22, %v2137_v7  ;;  %v792_v30 = vadd.f32 %v1472_v50, %v773_v15  ;;  %v973_v58 = vmul.f32 %v971_v10, %v2133_v4  ;;  %s2461_s8 = sld [smem:[#allocation10 + %s2888_s13]]  ;;  %s2892_s13 = sadd.s32 15, %s2093_s10 }
  0xb6   : > { %v669_v28 = vadd.f32 %v667_v41, %v650_v43  ;;  %v1480_v31 = vrot.slane %v840_v23, 11  ;;  %v982_v37 = vmul.f32 %v980_v11, %v2133_v4  ;;  %v1011_v38 = vmul.f32 %v1009_v21, %v2133_v4  ;;  %2885 = sst [smem:[#allocation34_spill]] %s2443_s2 }
  0xb7   : > { %v1115_v32 = vmul.f32 %v2160_v13, %v1102_v26  ;;  %v1116_v36 = vmul.f32 %v2160_v13, %v1106_v27  ;;  %v821_v40 = vadd.f32 %v1476_v51, %v792_v30  ;;  %v1040_v10 = vmul.f32 %v1038_v29, %v2133_v4  ;;  %s2465_s24 = sld [smem:[#allocation7 + %s2889_s25]] }
  0xb8   : > { %v690_v39 = vrot.slane %v669_v28, %v2137_v7  ;;  %v694_v41 = vrot.slane %v669_v28, %v2139_v8  ;;  %v1485_v21 = vrot.slane %v982_v37, 9  ;;  %v1489_v44 = vrot.slane %v1011_v38, 10  ;;  %s2476_s7 = sld [smem:[#allocation7 + %s2890_s27]]  ;;  %s2496_s27 = sshll.u32 %s1916_s28, 8 }
  0xb9   : > { %v1119_v11 = vadd.f32 %v1115_v32, %v919_v24  ;;  %v1120_v42 = vadd.f32 %v1116_v36, %v920_v25  ;;  %v850_v47 = vadd.f32 %v1480_v31, %v821_v40  ;;  %v1493_v29 = vrot.slane %v1040_v10, 11  ;;  %s2488_s25 = sld [smem:[#allocation7 + %s2892_s13]] }
  0xba   : > { %v710_v45 = vrot.slane %v690_v39, %v2137_v7  ;;  %v714_v46 = vrot.slane %v694_v41, %v2137_v7  ;;  %v992_v49 = vadd.f32 %v1485_v21, %v973_v58  ;;  %v376_v52 = vstv %s2327_s29  ;;  %2887 = sst [smem:[#allocation35_spill]] %s2452_s16 }
  0xbb   : > { %v1173_v48 = vcombine.low %v1119_v11, %v1120_v42  ;;  %v395_v54 = vstv %s2331_s9  ;;  %v869_v57 = vadd.f32 %v867_v59, %v850_v47  ;;  %v377_v60 = vmul.f32 %v376_v52, %v2125_v2  ;;  %2893 = sst [smem:[#allocation36_spill]] %s2496_s27 }
  0xbc   : > { %v717_v55 = vmul.f32 %v2147_v9, %v710_v45  ;;  %v718_v56 = vmul.f32 %v2147_v9, %v714_v46  ;;  %v1021_v62 = vadd.f32 %v1489_v44, %v992_v49  ;;  %v396_v59 = vmul.f32 %v395_v54, %v2125_v2 }
  0xbd   : > { %1177 = vst [vmem:[%s2395_s1] sm:$0xff] %v1173_v48  ;;  %v424_v0 = vstv %s2340_s11  ;;  %v453_v1 = vstv %s2344_s4  ;;  %1189 = vst [vmem:[%s2404_s23] sm:$0xff] %v1173_v48  ;;  %v890_v5 = vrot.slane %v869_v57, %v2137_v7  ;;  %v894_v14 = vrot.slane %v869_v57, %v2139_v8 }
  0xbe   : > { %v721_v3 = vadd.f32 %v717_v55, %v2301_v63  ;;  %v722_v33 = vadd.f32 %v718_v56, %v2304_v61  ;;  %v1050_v15 = vadd.f32 %v1493_v29, %v1021_v62  ;;  %v1447_v16 = vrot.slane %v396_v59, 9 }
  0xbf   : > { %v425_v17 = vmul.f32 %v424_v0, %v2125_v2  ;;  %v454_v63 = vmul.f32 %v453_v1, %v2125_v2  ;;  %v910_v61 = vrot.slane %v890_v5, %v2137_v7  ;;  %v914_v53 = vrot.slane %v894_v14, %v2137_v7 }
  0xc0   : > { %v471_v18 = vstv %s2365_s19  ;;  %v575_v35 = vstv %s2369_s0  ;;  %v1069_v19 = vadd.f32 %v1067_v34, %v1050_v15  ;;  %v406_v20 = vadd.f32 %v1447_v16, %v377_v60 }
  0xc1   : > { %v1451_v22 = vrot.slane %v425_v17, 10  ;;  %v1455_v43 = vrot.slane %v454_v63, 11  ;;  %v917_v50 = vmul.f32 %v2157_v12, %v910_v61  ;;  %v918_v51 = vmul.f32 %v2157_v12, %v914_v53 }
  0xc2   : > { %v576_v23 = vmul.f32 %v575_v35, %v2125_v2  ;;  %v594_v24 = vstv %s2375_s18  ;;  %v1090_v34 = vrot.slane %v1069_v19, %v2137_v7  ;;  %v1094_v25 = vrot.slane %v1069_v19, %v2139_v8  ;;  %s2480_s18 = sld [smem:[#allocation7 + %s2891_s21]]  ;;  %s1215_s21 = sshll.u32 %s2404_s23, 4  ;;  %s2528_s21 = int_to_ptr.vmem [resolvable:$true] %s1215_s21 }
  0xc3   : > { %v435_v26 = vadd.f32 %v1451_v22, %v406_v20  ;;  %v595_v27 = vmul.f32 %v594_v24, %v2125_v2  ;;  %v921_v28 = vadd.f32 %v917_v50, %v721_v3  ;;  %v922_v30 = vadd.f32 %v918_v51, %v722_v33 }
  0xc4   : > { %v623_v31 = vstv %s2388_s17  ;;  %v652_v58 = vstv %s2392_s20  ;;  %v1110_v32 = vrot.slane %v1090_v34, %v2137_v7  ;;  %v1114_v36 = vrot.slane %v1094_v25, %v2137_v7  ;;  %s2517_s20 = scalar_lea.hbm %s2796_s6, %s2496_s27 }
  0xc5   : > { %v464_v37 = vadd.f32 %v1455_v43, %v435_v26  ;;  %v1460_v38 = vrot.slane %v595_v27, 9  ;;  %v624_v39 = vmul.f32 %v623_v31, %v2125_v2  ;;  %v653_v41 = vmul.f32 %v652_v58, %v2125_v2 }
  0xc6   : > { %v775_v40 = vstv %s2413_s30  ;;  %v1117_v10 = vmul.f32 %v2160_v13, %v1110_v32  ;;  %v1118_v11 = vmul.f32 %v2160_v13, %v1114_v36  ;;  %v794_v47 = vstv %s2427_s3  ;;  %s2894_s30 = sadd.s32 3, %s2096_s22  ;;  %s2895_s22 = sand.u32 1, %s1916_s28  }
  0xc7   : > { %v472_v42 = vadd.f32 %v471_v18, %v464_v37  ;;  %v605_v21 = vadd.f32 %v1460_v38, %v576_v23  ;;  %v1464_v44 = vrot.slane %v624_v39, 10  ;;  %v1468_v45 = vrot.slane %v653_v41, 11  ;;  %s2526_s3 = sld [smem:[#allocation10 + %s2894_s30]]  ;;  %s1702_s30 = scalar_lea.vmem %s2498_s15, 256 }
  0xc8   : > { %v776_v46 = vmul.f32 %v775_v40, %v2125_v2  ;;  %v1121_v29 = vadd.f32 %v1117_v10, %v921_v28  ;;  %v1122_v48 = vadd.f32 %v1118_v11, %v922_v30  ;;  %v795_v57 = vmul.f32 %v794_v47, %v2125_v2  ;;  %p1703_p3 = scmp.ne.s32.totalorder %s2498_s15, %s1702_s30 }
  0xc9   : > { %v528_v49 = vrot.slane %v472_v42, %v2137_v7  ;;  %v532_v55 = vrot.slane %v472_v42, %v2139_v8  ;;  %v634_v56 = vadd.f32 %v1464_v44, %v605_v21  ;;  %v823_v60 = vstv %s2439_s26 }
  0xca   : > { %v852_v62 = vstv %s2443_s2  ;;  %v1174_v59 = vcombine.low %v1121_v29, %v1122_v48  ;;  %v671_v33 = vstv %s2452_s16  ;;  %v824_v5 = vmul.f32 %v823_v60, %v2125_v2  ;;  %s2541_s2 = scalar_lea.hbm %s2795_s5, %s2496_s27  ;;  %p1704_p9 = pnand %p1703_p3, %p2896_p5 }
  0xcb   : > { %v548_v3 = vrot.slane %v528_v49, %v2137_v7  ;;  %v663_v14 = vadd.f32 %v1468_v45, %v634_v56  ;;  %v1473_v15 = vrot.slane %v795_v57, 9  ;;  %v2522_v16 = vmul.f32 %v852_v62, %v2125_v2 }
  0xcc   : > { %1178 = vst [vmem:[%s2395_s1 + $0x8] sm:$0xff] %v1174_v59  ;;  %v2532_v17 = vrot.slane %v532_v55, %v2137_v7  ;;  %v1477_v63 = vrot.slane %v824_v5, 10  ;;  %v871_v61 = vstv %s2461_s8  ;;  %v975_v53 = vstv %s2465_s24  ;;  %1190 = vst [vmem:[%s2404_s23 + $0x8] sm:$0xff] %v1174_v59  ;;  %s2553_s1 = scalar_lea.sflag [#allocation14], %s2895_s22  ;;  %p1705_p11 = pneg %p1704_p9 }
  0xcd   : > { %v2544_v19 = vmul.f32 %v2135_v6, %v548_v3  ;;  %v2548_v20 = vadd.f32 %v671_v33, %v663_v14  ;;  %v805_v22 = vadd.f32 %v1473_v15, %v776_v46  ;;  %v1481_v43 = vrot.slane %v2522_v16, 11  ;;  %s1850_s23 = smov [#allocation13]  }
  0xce   : > { %s1706_s10 = sshll.u32 %s1850_s23, 4  ;;  %s1707_s10 = int_to_ptr.vmem [resolvable:$false] %s1706_s10 }
  0xcf   : > { %s1708_s13 = scalar_lea.vmem %s1707_s10, 512  ;;  %p1709_p12 = scmp.lt.s32.totalorder %s2498_s15, %s1707_s10 }
  0xd0   : > { %p1710_p13 = scmp.lt.s32.totalorder %s1708_s13, %s1702_s30 }
  0xd2   : > { %p1711_p0 = por %p1710_p13, %p1709_p12 }
  0xd4   : > { %p1712_p6 = pnand %p1711_p0, %p1705_p11 }
  0xd6   : > { %1715 = shalt.err (!%p1712_p6)
}
  0xd7   : > { %s1716_s28 = scalar_lea.hbm %s2517_s20, 256  ;;  %s1720_s23 = scalar_lea.hbm %s2796_s6, 1536 }
  0xd8   : > { %p1717_p7 = scmp.ne.s32.totalorder %s2517_s20, %s1716_s28  ;;  %p1721_p2 = scmp.lt.u32.totalorder %s2517_s20, %s2796_s6 }
  0xd9   : > { %p1722_p10 = scmp.lt.u32.totalorder %s1720_s23, %s1716_s28  ;;  %p1724_p3 = scmp.lt.u32.totalorder %s1716_s28, %s2517_s20 }
  0xda   : > { %p1718_p4 = pnand %p1717_p7, %p2896_p5 }
  0xdb   : > { %p1723_p8 = por %p1722_p10, %p1721_p2 }
  0xdc   : > { %p1719_p1 = pneg %p1718_p4 }
  0xdd   : > { %p1725_p9 = por %p1724_p3, %p1723_p8 }
  0xdf   : > { %p1726_p11 = pnand %p1725_p9, %p1719_p1 }
  0xe1   : > { %1729 = shalt.err (!%p1726_p11)
}
  0xe2   : > { %s1851_s30 = smov 128   ;;  %s1852_s16 = smov 8   ;;  %v976_v50 = vmul.f32 %v975_v53, %v2125_v2  ;;  %v994_v51 = vstv %s2476_s7  ;;  %v1023_v23 = vstv %s2480_s18  ;;  %v1052_v34 = vstv %s2488_s25 }
  0xe3   : > { %1531 = dma.vmem_to_hbm [thread:$0]  (%p2896_p5), %s2498_s15, 256, %s2517_s20, %s2553_s1, %s1851_s30, %s1851_s30, %s1852_s16   ;;  %v728_v25 = vrot.slane %v2548_v20, %v2137_v7  ;;  %v732_v26 = vrot.slane %v2548_v20, %v2139_v8  ;;  %v834_v27 = vadd.f32 %v1477_v63, %v805_v22  ;;  %v995_v28 = vmul.f32 %v994_v51, %v2125_v2 }
  0xe4   : > { %s1730_s13 = scalar_lea.vmem %s2528_s21, 256  ;;  %s1853_s15 = smov [#allocation12]  }
  0xe5   : > { %p1731_p12 = scmp.ne.s32.totalorder %s2528_s21, %s1730_s13  ;;  %s1734_s20 = sshll.u32 %s1853_s15, 4  ;;  %s1735_s20 = int_to_ptr.vmem [resolvable:$false] %s1734_s20 }
  0xe6   : > { %s1736_s28 = scalar_lea.vmem %s1735_s20, 512  ;;  %p1737_p6 = scmp.lt.s32.totalorder %s2528_s21, %s1735_s20 }
  0xe7   : > { %p1732_p13 = pnand %p1731_p12, %p2896_p5  ;;  %p1738_p7 = scmp.lt.s32.totalorder %s1736_s28, %s1730_s13 }
  0xe9   : > { %p1733_p0 = pneg %p1732_p13  ;;  %p1739_p4 = por %p1738_p7, %p1737_p6 }
  0xeb   : > { %p1740_p1 = pnand %p1739_p4, %p1733_p0 }
  0xed   : > { %1743 = shalt.err (!%p1740_p1)
}
  0xee   : > { %s1744_s22 = scalar_lea.hbm %s2541_s2, 256  ;;  %s1748_s15 = scalar_lea.hbm %s2795_s5, 1536 }
  0xef   : > { %p1745_p2 = scmp.ne.s32.totalorder %s2541_s2, %s1744_s22  ;;  %p1749_p3 = scmp.lt.u32.totalorder %s2541_s2, %s2795_s5 }
  0xf0   : > { %p1750_p9 = scmp.lt.u32.totalorder %s1748_s15, %s1744_s22  ;;  %p1752_p12 = scmp.lt.u32.totalorder %s1744_s22, %s2541_s2 }
  0xf1   : > { %p1746_p10 = pnand %p1745_p2, %p2896_p5 }
  0xf2   : > { %p1751_p11 = por %p1750_p9, %p1749_p3 }
  0xf3   : > { %p1747_p8 = pneg %p1746_p10 }
  0xf4   : > { %p1753_p13 = por %p1752_p12, %p1751_p11 }
  0xf6   : > { %p1754_p0 = pnand %p1753_p13, %p1747_p8 }
  0xf8   : > { %1757 = shalt.err (!%p1754_p0)
}
  0xf9   : > { %s2897_s13 = scalar_lea.sflag [#allocation4], %s2081_s12  ;;  %v1024_v30 = vmul.f32 %v1023_v23, %v2125_v2  ;;  %v1053_v32 = vmul.f32 %v1052_v34, %v2125_v2  ;;  %v378_v36 = vmul.f32 %v376_v52, %v2133_v4  ;;  %v397_v37 = vmul.f32 %v395_v54, %v2133_v4  ;;  %s2904_s26 = sld [smem:[#allocation29_spill]] }
  0xfa   : > { %1530 = dma.vmem_to_hbm [thread:$0]  (%p2896_p5), %s2528_s21, 256, %s2541_s2, %s2897_s13, %s1851_s30, %s1851_s30, %s1852_s16   ;;  %v748_v38 = vrot.slane %v728_v25, %v2137_v7  ;;  %v752_v39 = vrot.slane %v732_v26, %v2137_v7  ;;  %v863_v41 = vadd.f32 %v1481_v43, %v834_v27  ;;  %v1486_v10 = vrot.slane %v995_v28, 9 }
  0xfb   : > { %v562_v11 = vmul.f32 %v2135_v6, %v2532_v17  ;;  %v1490_v2 = vrot.slane %v1024_v30, 10  ;;  %v1448_v42 = vrot.slane %v397_v37, 9  ;;  %v426_v52 = vmul.f32 %v424_v0, %v2133_v4  ;;  %s2905_s24 = sld [smem:[#allocation36_spill]]  ;;  %s2906_s18 = sld [smem:[#allocation42_spill]] }
  0xfc   : > { %v872_v54 = vadd.f32 %v871_v61, %v863_v41  ;;  %v1005_v21 = vadd.f32 %v1486_v10, %v976_v50  ;;  %v1494_v44 = vrot.slane %v1053_v32, 11  ;;  %v1071_v45 = vstv %s2526_s3  ;;  %s1854_s25 = smov [#allocation15]  }
  0xfd   : > { %v761_v46 = vmul.f32 %v2147_v9, %v748_v38  ;;  %v407_v29 = vadd.f32 %v1448_v42, %v378_v36  ;;  %v1452_v48 = vrot.slane %v426_v52, 10  ;;  %v455_v49 = vmul.f32 %v453_v1, %v2133_v4  ;;  %s1762_s21 = sshll.u32 %s1854_s25, 4  ;;  %s1763_s21 = int_to_ptr.vmem [resolvable:$false] %s1762_s21 }
  0xfe   : > { %v762_v55 = vmul.f32 %v2147_v9, %v752_v39  ;;  %v928_v56 = vrot.slane %v872_v54, %v2137_v7  ;;  %v932_v0 = vrot.slane %v872_v54, %v2139_v8  ;;  %v577_v57 = vmul.f32 %v575_v35, %v2133_v4  ;;  %s1764_s27 = scalar_lea.vmem %s1763_s21, 512 }
  0xff   : > { %v1034_v59 = vadd.f32 %v1490_v2, %v1005_v21  ;;  %v436_v3 = vadd.f32 %v1452_v48, %v407_v29  ;;  %v1456_v5 = vrot.slane %v455_v49, 11  ;;  %v596_v14 = vmul.f32 %v594_v24, %v2133_v4  ;;  %s2715_s7 = scalar_lea.vmem [#allocation15], %s2904_s26 }
 0x100   : > { %v948_v1 = vrot.slane %v928_v56, %v2137_v7  ;;  %v952_v15 = vrot.slane %v932_v0, %v2137_v7  ;;  %v625_v16 = vmul.f32 %v623_v31, %v2133_v4  ;;  %v654_v35 = vmul.f32 %v652_v58, %v2133_v4  ;;  %s1247_s3 = sshll.u32 %s2715_s7, 4  ;;  %s2737_s3 = int_to_ptr.vmem [resolvable:$true] %s1247_s3 }
 0x101   : > { %v765_v17 = vadd.f32 %v761_v46, %v2544_v19  ;;  %v1063_v63 = vadd.f32 %v1494_v44, %v1034_v59  ;;  %v465_v20 = vadd.f32 %v1456_v5, %v436_v3  ;;  %v1461_v22 = vrot.slane %v596_v14, 9  ;;  %s2743_s17 = scalar_lea.hbm %s2906_s18, %s2905_s24  ;;  %s1758_s2 = scalar_lea.vmem %s2737_s3, 256 }
 0x102   : > { %v766_v24 = vadd.f32 %v762_v55, %v562_v11  ;;  %v961_v43 = vmul.f32 %v2157_v12, %v948_v1  ;;  %v962_v50 = vmul.f32 %v2157_v12, %v952_v15  ;;  %v1465_v25 = vrot.slane %v625_v16, 10  ;;  %p1759_p6 = scmp.ne.s32.totalorder %s2737_s3, %s1758_s2  ;;  %p1765_p1 = scmp.lt.s32.totalorder %s2737_s3, %s1763_s21 }
 0x103   : > { %v1072_v26 = vadd.f32 %v1071_v45, %v1063_v63  ;;  %v473_v31 = vadd.f32 %v471_v18, %v465_v20  ;;  %v606_v27 = vadd.f32 %v1461_v22, %v577_v57  ;;  %v796_v58 = vmul.f32 %v794_v47, %v2133_v4  ;;  %p1766_p2 = scmp.lt.s32.totalorder %s1764_s27, %s1758_s2 }
 0x104   : > { %v1469_v28 = vrot.slane %v654_v35, 11  ;;  %v777_v19 = vmul.f32 %v775_v40, %v2133_v4  ;;  %v825_v30 = vmul.f32 %v823_v60, %v2133_v4  ;;  %v854_v32 = vmul.f32 %v852_v62, %v2133_v4  ;;  %p1760_p7 = pnand %p1759_p6, %p2896_p5 }
 0x105   : > { %v965_v36 = vadd.f32 %v961_v43, %v765_v17  ;;  %v1128_v37 = vrot.slane %v1072_v26, %v2137_v7  ;;  %v1132_v18 = vrot.slane %v1072_v26, %v2139_v8  ;;  %v536_v38 = vrot.slane %v473_v31, %v2137_v7  ;;  %p1767_p10 = por %p1766_p2, %p1765_p1 }
 0x106   : > { %v966_v47 = vadd.f32 %v962_v50, %v766_v24  ;;  %v635_v39 = vadd.f32 %v1465_v25, %v606_v27  ;;  %v1474_v41 = vrot.slane %v796_v58, 9  ;;  %v1478_v40 = vrot.slane %v825_v30, 10  ;;  %p1761_p4 = pneg %p1760_p7 }
 0x107   : > { %v1148_v60 = vrot.slane %v1128_v37, %v2137_v7  ;;  %v1152_v10 = vrot.slane %v1132_v18, %v2137_v7  ;;  %v540_v62 = vrot.slane %v473_v31, %v2139_v8  ;;  %v1482_v11 = vrot.slane %v854_v32, 11 }
 0x108   : > { %v664_v2 = vadd.f32 %v1469_v28, %v635_v39  ;;  %v806_v42 = vadd.f32 %v1474_v41, %v777_v19  ;;  %v977_v52 = vmul.f32 %v975_v53, %v2133_v4  ;;  %v996_v54 = vmul.f32 %v994_v51, %v2133_v4  ;;  %p1768_p8 = pnand %p1767_p10, %p1761_p4 }
 0x109   : > { %v1161_v21 = vmul.f32 %v2160_v13, %v1148_v60  ;;  %v1162_v44 = vmul.f32 %v2160_v13, %v1152_v10  ;;  %v556_v46 = vrot.slane %v536_v38, %v2137_v7  ;;  %v1025_v55 = vmul.f32 %v1023_v23, %v2133_v4 }
 0x10a   : > { %v673_v29 = vadd.f32 %v671_v33, %v664_v2  ;;  %v835_v48 = vadd.f32 %v1478_v40, %v806_v42  ;;  %v1487_v49 = vrot.slane %v996_v54, 9  ;;  %v560_v0 = vrot.slane %v540_v62, %v2137_v7 }
 0x10b   : > { %v1165_v56 = vadd.f32 %v1161_v21, %v965_v36  ;;  %v1166_v53 = vadd.f32 %v1162_v44, %v966_v47  ;;  %v1054_v51 = vmul.f32 %v1052_v34, %v2133_v4  ;;  %v1491_v14 = vrot.slane %v1025_v55, 10 }
 0x10c   : > { %v736_v57 = vrot.slane %v673_v29, %v2137_v7  ;;  %v740_v59 = vrot.slane %v673_v29, %v2139_v8  ;;  %v864_v3 = vadd.f32 %v1482_v11, %v835_v48  ;;  %v1006_v33 = vadd.f32 %v1487_v49, %v977_v52 }
 0x10d   : > { %v1183_v5 = vcombine.low %v1165_v56, %v1166_v53  ;;  %v1495_v1 = vrot.slane %v1054_v51, 11  ;;  %v563_v4 = vmul.f32 %v2135_v6, %v556_v46  ;;  %v564_v34 = vmul.f32 %v2135_v6, %v560_v0 }
 0x10e   : > { %v756_v15 = vrot.slane %v736_v57, %v2137_v7  ;;  %v760_v23 = vrot.slane %v740_v59, %v2137_v7  ;;  %v873_v16 = vadd.f32 %v871_v61, %v864_v3  ;;  %v1035_v35 = vadd.f32 %v1491_v14, %v1006_v33 }
 0x10f   : > { %1187 = vst [vmem:[%s2715_s7] sm:$0xff] %v1183_v5 }
 0x110   : > { %v763_v17 = vmul.f32 %v2147_v9, %v756_v15  ;;  %v764_v63 = vmul.f32 %v2147_v9, %v760_v23  ;;  %v936_v20 = vrot.slane %v873_v16, %v2137_v7  ;;  %v940_v22 = vrot.slane %v873_v16, %v2139_v8 }
 0x111   : > { %v1064_v24 = vadd.f32 %v1495_v1, %v1035_v35 }
 0x112   : > { %v956_v61 = vrot.slane %v936_v20, %v2137_v7  ;;  %v960_v43 = vrot.slane %v940_v22, %v2137_v7  ;;  %v767_v50 = vadd.f32 %v763_v17, %v563_v4  ;;  %v768_v25 = vadd.f32 %v764_v63, %v564_v34 }
 0x113   : > { %v1073_v26 = vadd.f32 %v1071_v45, %v1064_v24 }
 0x114   : > { %v963_v6 = vmul.f32 %v2157_v12, %v956_v61  ;;  %v964_v9 = vmul.f32 %v2157_v12, %v960_v43 }
 0x115   : > { %v1136_v31 = vrot.slane %v1073_v26, %v2137_v7  ;;  %v1140_v27 = vrot.slane %v1073_v26, %v2139_v8 }
 0x116   : > { %v967_v58 = vadd.f32 %v963_v6, %v767_v50  ;;  %v968_v28 = vadd.f32 %v964_v9, %v768_v25 }
 0x117   : > { %v1156_v19 = vrot.slane %v1136_v31, %v2137_v7  ;;  %v1160_v30 = vrot.slane %v1140_v27, %v2137_v7 }
 0x119   : > { %v1163_v32 = vmul.f32 %v2160_v13, %v1156_v19  ;;  %v1164_v45 = vmul.f32 %v2160_v13, %v1160_v30 }
 0x11b   : > { %v1167_v36 = vadd.f32 %v1163_v32, %v967_v58  ;;  %v1168_v37 = vadd.f32 %v1164_v45, %v968_v28 }
 0x11d   : > { %v1184_v8 = vcombine.low %v1167_v36, %v1168_v37 }
 0x11f   : > { %1188 = vst [vmem:[%s2715_s7 + $0x8] sm:$0xff] %v1184_v8 }
 0x120   : > { %1771 = shalt.err (!%p1768_p8)
}
 0x121   : > { %s1772_s28 = scalar_lea.hbm %s2743_s17, 256  ;;  %s1776_s10 = scalar_lea.hbm %s2906_s18, 1536 }
 0x122   : > { %p1773_p3 = scmp.ne.s32.totalorder %s2743_s17, %s1772_s28  ;;  %p1777_p12 = scmp.lt.u32.totalorder %s2743_s17, %s2906_s18 }
 0x123   : > { %p1778_p13 = scmp.lt.u32.totalorder %s1776_s10, %s1772_s28  ;;  %p1780_p6 = scmp.lt.u32.totalorder %s1772_s28, %s2743_s17 }
 0x124   : > { %p1774_p9 = pnand %p1773_p3, %p2896_p5 }
 0x125   : > { %p1779_p0 = por %p1778_p13, %p1777_p12 }
 0x126   : > { %p1775_p11 = pneg %p1774_p9 }
 0x127   : > { %p1781_p7 = por %p1780_p6, %p1779_p0 }
 0x129   : > { %p1782_p4 = pnand %p1781_p7, %p1775_p11 }
 0x12b   : > { %1785 = shalt.err (!%p1782_p4)
}
 0x12c   : > { %1532 = dma.vmem_to_hbm [thread:$0]  (%p2896_p5), %s2737_s3, 256, %s2743_s17, %s2553_s1, %s1851_s30, %s1851_s30, %s1852_s16  }
 0x12d PF: > { %s2907_s13 = sld [smem:[#allocation25_spill]]  ;;  %s2908_s12 = sld [smem:[#allocation22_spill]] }
 0x12e   : > { %s2909_s29 = sld [smem:[#allocation26_spill]] }
 0x133   : > { %p1572_p1 = scmp.ge.s32.totalorder %s2907_s13, 2  ;;  %s1262_s4 = sand.u32 1, %s2908_s12  }
 0x134   : > { %p2910_p2 = scmp.ne.s32.totalorder %s2909_s29, 0  ;;  %s1263_s9 = scalar_lea.sflag [#allocation4], %s1262_s4 }
 0x136   : > { %p1554_p10 = pnand %p1572_p1, %p2910_p2 }
 0x138   : > { %1819 = dma.done.wait (!%p1554_p10), %s1263_s9, 256  }
 0x139   : > { %1821 = vsyncadd (!%p1554_p10), %s1263_s9, 4294967040  ;;  %s2911_s14 = sadd.s32 4294967294, %s2907_s13  }
 0x13a   : > { %s1271_s11 = sand.u32 1, %s2911_s14  }
 0x13b   : > { %s1272_s19 = scalar_lea.sflag [#allocation14], %s1271_s11 }
 0x13c   : > { %1823 = dma.done.wait (!%p1554_p10), %s1272_s19, 512  }
 0x13d   : > { %1825 = vsyncadd (!%p1554_p10), %s1272_s19, 4294966784  ;;  %s2912_s27 = sld [smem:[#allocation27_spill]]  ;;  %s2913_s24 = sld [smem:[#allocation23_spill]] }
 0x13e   : > { %s2914_s25 = sld [smem:[#allocation24_spill]]  ;;  %s2915_s26 = sld [smem:[#allocation28_spill]] }
 0x143   : > { %p27_p5 = scmp.ge.s32.totalorder %s2912_s27, 8  }
 0x145   :  { %29 = sbr.rel (!%p27_p5) target bundleno = 17 (0x11), region = 135 }
 0x14c   :  { %1286 = vsyncpa [#allocation3], 1 }
 0x14d   :  { %1288 = vsyncpa [#allocation3 + $0x1], 1 }
 0x14e   :  { %1289 = vsyncpa [#allocation4], 1 }
 0x14f   :  { %1291 = vsyncpa [#allocation4 + $0x1], 1 }
 0x150   :  { %1292 = vsyncpa [#allocation14], 1 }
 0x151   :  { %1294 = vsyncpa [#allocation14 + $0x1], 1 }
 0x152   :  { %1295 = vsyncpa [#allocation5], 1 }
 0x153   :  { %1297 = vsyncpa [#allocation5 + $0x1], 1 }
 0x154   :  { %1298 = vsyncpa [#allocation6], 1 }
 0x155   :  { %1300 = vsyncpa [#allocation6 + $0x1], 1 }
 0x156   :  { %1301 = vsyncpa [#allocation9], 1 }

</bundles_post_ra>
